<compile_context>
chip_gen: v7x
topology: tpu7x:2x2x1
jax: 0.10.0
libtpu: 0.0.40
codegen_flags: <defaults>
</compile_context>

<pallas_src>
import math
import functools

import jax
import jax.numpy as jnp
import numpy as np
from jax.experimental import pallas as pl
from jax.experimental.pallas import tpu as pltpu


# ----------------------------- kernel ---------------------------------------


def attblock_kernel(
    x_ref,                                  # (T, DP)       f32  tokens (zero-padded features)
    wq_ref, wk_ref, wv_ref,                 # (DP, EP)      bf16 fused (Q_w@Wiq*scale / K_w@Wik / V_w@Wiv)
    bq_ref, bk_ref, bv_ref,                 # (1, EP)       f32  fused in-proj biases
    woh_ref,                                # (H, HDP, DOP) bf16 fused (out_proj @ lin), head-major rows
    bo_ref,                                 # (1, DOP)      f32  fused bias  bo@Wl + bl
    o_ref,                                  # (T, DOP)      f32
    *,
    batch, seq, num_heads, head_dim_p,
):
    f32 = jnp.float32
    bf16 = jnp.bfloat16

    xb = x_ref[...].astype(bf16)                                            # (T, DP)

    # ---- fused Q/K/V projections (AttBlock proj + MHA in-proj in one matmul).
    #      Q is pre-scaled by 1/sqrt(head_dim) via the fused weight/bias.
    qp = jnp.dot(xb, wq_ref[...], preferred_element_type=f32) + bq_ref[...]  # (T, EP)
    kp = jnp.dot(xb, wk_ref[...], preferred_element_type=f32) + bk_ref[...]
    vp = jnp.dot(xb, wv_ref[...], preferred_element_type=f32) + bv_ref[...]

    def split_heads(t):
        # (seq, EP) f32 -> (H, seq, HDP) bf16; each head is a 32-lane-aligned
        # slab moved onto the leading (batched-matmul) axis.
        t = t.astype(bf16)
        return jnp.concatenate(
            [t[:, h * head_dim_p:(h + 1) * head_dim_p][None] for h in range(num_heads)],
            axis=0,
        )

    out_rows = []
    for b in range(batch):                       # static unroll (batch folded into one call)
        r = b * seq
        qh = split_heads(qp[r:r + seq])          # (H, S, HDP)
        kh = split_heads(kp[r:r + seq])
        vh = split_heads(vp[r:r + seq])

        # ---- head-batched scaled-dot-product attention (scale already folded into Q)
        s = jnp.einsum("hqd,hkd->hqk", qh, kh, preferred_element_type=f32)   # (H, S, S)
        m = jnp.max(s, axis=-1, keepdims=True)
        e = jnp.exp(s - m)
        p = e * pl.reciprocal(jnp.sum(e, axis=-1, keepdims=True), approx=True)
        oh = jnp.einsum("hqk,hkd->hqd", p.astype(bf16), vh,
                        preferred_element_type=f32)                          # (H, S, HDP)

        # ---- fused (MHA out-proj @ AttBlock.lin), applied per head, reduced
        #      over heads: head outputs never re-packed onto the lane axis.
        pr = jnp.einsum("hsd,hdo->hso", oh.astype(bf16), woh_ref[...],
                        preferred_element_type=f32)                          # (H, S, DOP)
        out_rows.append(jnp.sum(pr, axis=0) + bo_ref[...])                   # (S, DOP)

    # lane-dense full-block store
    o_ref[...] = jnp.concatenate(out_rows, axis=0)                           # (T, DOP)


# ----------------------------- wrapper ---------------------------------------


def _round_up(n, m):
    return ((n + m - 1) // m) * m


def _pad2d(a, rows, cols):
    r, c = a.shape
    return jnp.pad(a, ((0, rows - r), (0, cols - c)))


def _head_pad_cols(w, num_heads, hd, hdp):
    # (R, H*hd) -> (R, H*hdp): head h's hd columns land at [h*hdp, h*hdp+hd).
    r = w.shape[0]
    w3 = w.reshape(r, num_heads, hd)
    w3 = jnp.pad(w3, ((0, 0), (0, 0), (0, hdp - hd)))
    return w3.reshape(r, num_heads * hdp)


def _head_pad_rows(w, num_heads, hd, hdp):
    # (H*hd, C) -> (H*hdp, C): head h's hd rows land at [h*hdp, h*hdp+hd).
    c = w.shape[1]
    w3 = w.reshape(num_heads, hd, c)
    w3 = jnp.pad(w3, ((0, 0), (0, hdp - hd), (0, 0)))
    return w3.reshape(num_heads * hdp, c)


def _zero_map(ndim):
    return lambda i: (0,) * ndim


def attblock_forward(x, params, *, num_heads=8, head_dims=24):
    B, S, D = x.shape
    E = num_heads * head_dims
    Dout = params["wl"].shape[1]
    scale = 1.0 / math.sqrt(E // num_heads)     # torch MHA scaling: 1/sqrt(E/H)

    HDP = _round_up(head_dims, 32)              # padded per-head width (32-lane slabs)
    EP = num_heads * HDP                        # padded embed width
    DP = _round_up(D, 128)                      # lane-dense input feature width
    DOP = _round_up(Dout, 128)                  # lane-dense output feature width
    T = B * S
    bf = jnp.bfloat16

    # ---- weight fusion (f32, once, outside the kernel) -----------------------
    wq_f = (params["wq"] @ params["wiq"]) * scale        # (D, E)
    wk_f = params["wk"] @ params["wik"]                  # (D, E)
    wv_f = params["wv"] @ params["wiv"]                  # (D, E)
    bq_f = params["biq"] * scale                         # (1, E)
    bk_f = params["bik"]
    bv_f = params["biv"]
    wol = params["wo"] @ params["wl"]                    # (E, Dout)
    bol = params["bo"] @ params["wl"] + params["bl"]     # (1, Dout)

    # ---- layout plumbing (exact zero padding; outside the kernel) ------------
    xp = jnp.pad(x.reshape(T, D), ((0, 0), (0, DP - D)))                     # (T, DP) f32

    def qkv_w(w):
        return _pad2d(_head_pad_cols(w, num_heads, head_dims, HDP), DP, EP).astype(bf)

    def qkv_b(b):
        return _head_pad_cols(b, num_heads, head_dims, HDP)                  # (1, EP) f32

    wq, wk, wv = qkv_w(wq_f), qkv_w(wk_f), qkv_w(wv_f)
    bq, bk, bv = qkv_b(bq_f), qkv_b(bk_f), qkv_b(bv_f)

    wolp = _pad2d(_head_pad_rows(wol, num_heads, head_dims, HDP), EP, DOP)
    woh = wolp.reshape(num_heads, HDP, DOP).astype(bf)                       # (H, HDP, DOP)
    bo = _pad2d(bol, 1, DOP)                                                 # (1, DOP) f32

    weights = [wq, wk, wv, bq, bk, bv, woh, bo]

    kernel = functools.partial(
        attblock_kernel,
        batch=B, seq=S, num_heads=num_heads, head_dim_p=HDP,
    )

    in_specs = [pl.BlockSpec(xp.shape, _zero_map(xp.ndim))]
    for wgt in weights:
        in_specs.append(pl.BlockSpec(wgt.shape, _zero_map(wgt.ndim)))

    out = pl.pallas_call(
        kernel,
        out_shape=jax.ShapeDtypeStruct((T, DOP), jnp.float32),
        grid=(1,),
        in_specs=in_specs,
        out_specs=pl.BlockSpec((T, DOP), lambda i: (0, 0)),
        compiler_params=pltpu.CompilerParams(dimension_semantics=("arbitrary",)),
    )(xp, *weights)

    return out[:, :Dout].reshape(B, S, Dout)


# ----------------------------- pure-JAX reference -----------------------------


def ref_attblock(x, p, *, num_heads, head_dims):
    B, S, D = x.shape
    E = num_heads * head_dims
    Q = x @ p["wq"]
    K = x @ p["wk"]
    V = x @ p["wv"]
    Qp = Q @ p["wiq"] + p["biq"]
    Kp = K @ p["wik"] + p["bik"]
    Vp = V @ p["wiv"] + p["biv"]

    def split(t):
        return t.reshape(B, S, num_heads, head_dims).transpose(0, 2, 1, 3)

    qh, kh, vh = split(Qp), split(Kp), split(Vp)
    s = jnp.einsum("bhqd,bhkd->bhqk", qh, kh) / math.sqrt(head_dims)
    pr = jax.nn.softmax(s, axis=-1)
    o = jnp.einsum("bhqk,bhkd->bhqd", pr, vh).transpose(0, 2, 1, 3).reshape(B, S, E)
    o = o @ p["wo"] + p["bo"]
    return o @ p["wl"] + p["bl"]


# ----------------------------- init & main -------------------------------------


def init_params(key, in_features, num_heads, head_dims, out_features=None):
    out_features = out_features or in_features
    E = num_heads * head_dims
    ks = jax.random.split(key, 13)

    def w(k, shape, scale=0.05):
        return (scale * jax.random.normal(k, shape)).astype(jnp.float32)

    # All weights stored pre-transposed ((in, out)) relative to torch nn.Linear.
    return {
        "wq": w(ks[0], (in_features, E)),
        "wk": w(ks[1], (in_features, E)),
        "wv": w(ks[2], (in_features, E)),
        "wiq": w(ks[3], (E, E)),
        "wik": w(ks[4], (E, E)),
        "wiv": w(ks[5], (E, E)),
        "biq": w(ks[6], (1, E)),
        "bik": w(ks[7], (1, E)),
        "biv": w(ks[8], (1, E)),
        "wo": w(ks[9], (E, E)),
        "bo": w(ks[10], (1, E)),
        "wl": w(ks[11], (E, out_features)),
        "bl": w(ks[12], (1, out_features)),
    }


if __name__ == "__main__":
    B, S, D = 2, 8, 32
    num_heads, head_dims = 8, 24            # module defaults -> embed dim E = 192

    key = jax.random.PRNGKey(0)
    kx, kp = jax.random.split(key)
    x = jax.random.normal(kx, (B, S, D), dtype=jnp.float32)
    params = init_params(kp, D, num_heads, head_dims)

    out = jax.block_until_ready(
        attblock_forward(x, params, num_heads=num_heads, head_dims=head_dims)
    )
    ref = jax.block_until_ready(
        ref_attblock(x, params, num_heads=num_heads, head_dims=head_dims)
    )

    assert out.shape == (B, S, D)
    # bf16 matmul operands (f32 accumulation) vs. the f32 reference -> loosened tolerance.
    np.testing.assert_allclose(np.asarray(out), np.asarray(ref), atol=5e-3, rtol=5e-2)
    print("KERNEL_OK")
</pallas_src>

<mosaic_0001>
module attributes {stable_mosaic.version = 11 : i64} {
  func.func @attblock_kernel(%arg0: i32, %arg1: memref<16x128xf32, #tpu.memory_space<vmem>>, %arg2: memref<128x256xbf16, #tpu.memory_space<vmem>>, %arg3: memref<128x256xbf16, #tpu.memory_space<vmem>>, %arg4: memref<128x256xbf16, #tpu.memory_space<vmem>>, %arg5: memref<1x256xf32, #tpu.memory_space<vmem>>, %arg6: memref<1x256xf32, #tpu.memory_space<vmem>>, %arg7: memref<1x256xf32, #tpu.memory_space<vmem>>, %arg8: memref<8x32x128xbf16, #tpu.memory_space<vmem>>, %arg9: memref<1x128xf32, #tpu.memory_space<vmem>>, %arg10: memref<16x128xf32, #tpu.memory_space<vmem>>) attributes {dimension_semantics = [#tpu.dimension_semantics<arbitrary>], iteration_bounds = array<i64: 1>, scalar_prefetch = 0 : i64, scratch_operands = 0 : i64, tpu.core_type = #tpu.core_type<tc>, window_params = [{pipeline_mode = #tpu.pipeline_mode<synchronous>, transform_indices = @transform_0, window_bounds = array<i64: 16, 128>}, {pipeline_mode = #tpu.pipeline_mode<synchronous>, transform_indices = @transform_1, window_bounds = array<i64: 128, 256>}, {pipeline_mode = #tpu.pipeline_mode<synchronous>, transform_indices = @transform_2, window_bounds = array<i64: 128, 256>}, {pipeline_mode = #tpu.pipeline_mode<synchronous>, transform_indices = @transform_3, window_bounds = array<i64: 128, 256>}, {pipeline_mode = #tpu.pipeline_mode<synchronous>, transform_indices = @transform_4, window_bounds = array<i64: 1, 256>}, {pipeline_mode = #tpu.pipeline_mode<synchronous>, transform_indices = @transform_5, window_bounds = array<i64: 1, 256>}, {pipeline_mode = #tpu.pipeline_mode<synchronous>, transform_indices = @transform_6, window_bounds = array<i64: 1, 256>}, {pipeline_mode = #tpu.pipeline_mode<synchronous>, transform_indices = @transform_7, window_bounds = array<i64: 8, 32, 128>}, {pipeline_mode = #tpu.pipeline_mode<synchronous>, transform_indices = @transform_8, window_bounds = array<i64: 1, 128>}, {pipeline_mode = #tpu.pipeline_mode<synchronous>, transform_indices = @transform_9, window_bounds = array<i64: 16, 128>}]} {
    %c0 = arith.constant 0 : index
    %c0_0 = arith.constant 0 : index
    %0 = vector.load %arg1[%c0, %c0_0] : memref<16x128xf32, #tpu.memory_space<vmem>>, vector<16x128xf32>
    %1 = arith.truncf %0 : vector<16x128xf32> to vector<16x128xbf16>
    %c0_1 = arith.constant 0 : index
    %c0_2 = arith.constant 0 : index
    %2 = vector.load %arg2[%c0_1, %c0_2] : memref<128x256xbf16, #tpu.memory_space<vmem>>, vector<128x256xbf16>
    %cst = arith.constant dense<0.000000e+00> : vector<16x256xf32>
    %3 = tpu.matmul %1, %2, %cst {dimension_numbers = #tpu.dot_dimension_numbers<[1], [0], [0], [1], [0, 0, 1, 1], [], []>} : vector<16x128xbf16>, vector<128x256xbf16>, vector<16x256xf32> -> vector<16x256xf32>
    %c0_3 = arith.constant 0 : index
    %c0_4 = arith.constant 0 : index
    %4 = vector.load %arg5[%c0_3, %c0_4] : memref<1x256xf32, #tpu.memory_space<vmem>>, vector<1x256xf32>
    %5 = vector.broadcast %4 : vector<1x256xf32> to vector<16x256xf32>
    %6 = arith.addf %3, %5 : vector<16x256xf32>
    %c0_5 = arith.constant 0 : index
    %c0_6 = arith.constant 0 : index
    %7 = vector.load %arg3[%c0_5, %c0_6] : memref<128x256xbf16, #tpu.memory_space<vmem>>, vector<128x256xbf16>
    %cst_7 = arith.constant dense<0.000000e+00> : vector<16x256xf32>
    %8 = tpu.matmul %1, %7, %cst_7 {dimension_numbers = #tpu.dot_dimension_numbers<[1], [0], [0], [1], [0, 0, 1, 1], [], []>} : vector<16x128xbf16>, vector<128x256xbf16>, vector<16x256xf32> -> vector<16x256xf32>
    %c0_8 = arith.constant 0 : index
    %c0_9 = arith.constant 0 : index
    %9 = vector.load %arg6[%c0_8, %c0_9] : memref<1x256xf32, #tpu.memory_space<vmem>>, vector<1x256xf32>
    %10 = vector.broadcast %9 : vector<1x256xf32> to vector<16x256xf32>
    %11 = arith.addf %8, %10 : vector<16x256xf32>
    %c0_10 = arith.constant 0 : index
    %c0_11 = arith.constant 0 : index
    %12 = vector.load %arg4[%c0_10, %c0_11] : memref<128x256xbf16, #tpu.memory_space<vmem>>, vector<128x256xbf16>
    %cst_12 = arith.constant dense<0.000000e+00> : vector<16x256xf32>
    %13 = tpu.matmul %1, %12, %cst_12 {dimension_numbers = #tpu.dot_dimension_numbers<[1], [0], [0], [1], [0, 0, 1, 1], [], []>} : vector<16x128xbf16>, vector<128x256xbf16>, vector<16x256xf32> -> vector<16x256xf32>
    %c0_13 = arith.constant 0 : index
    %c0_14 = arith.constant 0 : index
    %14 = vector.load %arg7[%c0_13, %c0_14] : memref<1x256xf32, #tpu.memory_space<vmem>>, vector<1x256xf32>
    %15 = vector.broadcast %14 : vector<1x256xf32> to vector<16x256xf32>
    %16 = arith.addf %13, %15 : vector<16x256xf32>
    %17 = vector.extract_strided_slice %6 {offsets = [0, 0], sizes = [8, 256], strides = [1, 1]} : vector<16x256xf32> to vector<8x256xf32>
    %18 = arith.truncf %17 : vector<8x256xf32> to vector<8x256xbf16>
    %19 = vector.extract_strided_slice %18 {offsets = [0, 0], sizes = [8, 32], strides = [1, 1]} : vector<8x256xbf16> to vector<8x32xbf16>
    %20 = vector.shape_cast %19 : vector<8x32xbf16> to vector<1x8x32xbf16>
    %21 = vector.extract_strided_slice %18 {offsets = [0, 32], sizes = [8, 32], strides = [1, 1]} : vector<8x256xbf16> to vector<8x32xbf16>
    %22 = vector.shape_cast %21 : vector<8x32xbf16> to vector<1x8x32xbf16>
    %23 = vector.extract_strided_slice %18 {offsets = [0, 64], sizes = [8, 32], strides = [1, 1]} : vector<8x256xbf16> to vector<8x32xbf16>
    %24 = vector.shape_cast %23 : vector<8x32xbf16> to vector<1x8x32xbf16>
    %25 = vector.extract_strided_slice %18 {offsets = [0, 96], sizes = [8, 32], strides = [1, 1]} : vector<8x256xbf16> to vector<8x32xbf16>
    %26 = vector.shape_cast %25 : vector<8x32xbf16> to vector<1x8x32xbf16>
    %27 = vector.extract_strided_slice %18 {offsets = [0, 128], sizes = [8, 32], strides = [1, 1]} : vector<8x256xbf16> to vector<8x32xbf16>
    %28 = vector.shape_cast %27 : vector<8x32xbf16> to vector<1x8x32xbf16>
    %29 = vector.extract_strided_slice %18 {offsets = [0, 160], sizes = [8, 32], strides = [1, 1]} : vector<8x256xbf16> to vector<8x32xbf16>
    %30 = vector.shape_cast %29 : vector<8x32xbf16> to vector<1x8x32xbf16>
    %31 = vector.extract_strided_slice %18 {offsets = [0, 192], sizes = [8, 32], strides = [1, 1]} : vector<8x256xbf16> to vector<8x32xbf16>
    %32 = vector.shape_cast %31 : vector<8x32xbf16> to vector<1x8x32xbf16>
    %33 = vector.extract_strided_slice %18 {offsets = [0, 224], sizes = [8, 32], strides = [1, 1]} : vector<8x256xbf16> to vector<8x32xbf16>
    %34 = vector.shape_cast %33 : vector<8x32xbf16> to vector<1x8x32xbf16>
    %35 = tpu.concatenate %20, %22, %24, %26, %28, %30, %32, %34 in 0 : vector<1x8x32xbf16>, vector<1x8x32xbf16>, vector<1x8x32xbf16>, vector<1x8x32xbf16>, vector<1x8x32xbf16>, vector<1x8x32xbf16>, vector<1x8x32xbf16>, vector<1x8x32xbf16> -> vector<8x8x32xbf16>
    %36 = vector.extract_strided_slice %11 {offsets = [0, 0], sizes = [8, 256], strides = [1, 1]} : vector<16x256xf32> to vector<8x256xf32>
    %37 = arith.truncf %36 : vector<8x256xf32> to vector<8x256xbf16>
    %38 = vector.extract_strided_slice %37 {offsets = [0, 0], sizes = [8, 32], strides = [1, 1]} : vector<8x256xbf16> to vector<8x32xbf16>
    %39 = vector.shape_cast %38 : vector<8x32xbf16> to vector<1x8x32xbf16>
    %40 = vector.extract_strided_slice %37 {offsets = [0, 32], sizes = [8, 32], strides = [1, 1]} : vector<8x256xbf16> to vector<8x32xbf16>
    %41 = vector.shape_cast %40 : vector<8x32xbf16> to vector<1x8x32xbf16>
    %42 = vector.extract_strided_slice %37 {offsets = [0, 64], sizes = [8, 32], strides = [1, 1]} : vector<8x256xbf16> to vector<8x32xbf16>
    %43 = vector.shape_cast %42 : vector<8x32xbf16> to vector<1x8x32xbf16>
    %44 = vector.extract_strided_slice %37 {offsets = [0, 96], sizes = [8, 32], strides = [1, 1]} : vector<8x256xbf16> to vector<8x32xbf16>
    %45 = vector.shape_cast %44 : vector<8x32xbf16> to vector<1x8x32xbf16>
    %46 = vector.extract_strided_slice %37 {offsets = [0, 128], sizes = [8, 32], strides = [1, 1]} : vector<8x256xbf16> to vector<8x32xbf16>
    %47 = vector.shape_cast %46 : vector<8x32xbf16> to vector<1x8x32xbf16>
    %48 = vector.extract_strided_slice %37 {offsets = [0, 160], sizes = [8, 32], strides = [1, 1]} : vector<8x256xbf16> to vector<8x32xbf16>
    %49 = vector.shape_cast %48 : vector<8x32xbf16> to vector<1x8x32xbf16>
    %50 = vector.extract_strided_slice %37 {offsets = [0, 192], sizes = [8, 32], strides = [1, 1]} : vector<8x256xbf16> to vector<8x32xbf16>
    %51 = vector.shape_cast %50 : vector<8x32xbf16> to vector<1x8x32xbf16>
    %52 = vector.extract_strided_slice %37 {offsets = [0, 224], sizes = [8, 32], strides = [1, 1]} : vector<8x256xbf16> to vector<8x32xbf16>
    %53 = vector.shape_cast %52 : vector<8x32xbf16> to vector<1x8x32xbf16>
    %54 = tpu.concatenate %39, %41, %43, %45, %47, %49, %51, %53 in 0 : vector<1x8x32xbf16>, vector<1x8x32xbf16>, vector<1x8x32xbf16>, vector<1x8x32xbf16>, vector<1x8x32xbf16>, vector<1x8x32xbf16>, vector<1x8x32xbf16>, vector<1x8x32xbf16> -> vector<8x8x32xbf16>
    %55 = vector.extract_strided_slice %16 {offsets = [0, 0], sizes = [8, 256], strides = [1, 1]} : vector<16x256xf32> to vector<8x256xf32>
    %56 = arith.truncf %55 : vector<8x256xf32> to vector<8x256xbf16>
    %57 = vector.extract_strided_slice %56 {offsets = [0, 0], sizes = [8, 32], strides = [1, 1]} : vector<8x256xbf16> to vector<8x32xbf16>
    %58 = vector.shape_cast %57 : vector<8x32xbf16> to vector<1x8x32xbf16>
    %59 = vector.extract_strided_slice %56 {offsets = [0, 32], sizes = [8, 32], strides = [1, 1]} : vector<8x256xbf16> to vector<8x32xbf16>
    %60 = vector.shape_cast %59 : vector<8x32xbf16> to vector<1x8x32xbf16>
    %61 = vector.extract_strided_slice %56 {offsets = [0, 64], sizes = [8, 32], strides = [1, 1]} : vector<8x256xbf16> to vector<8x32xbf16>
    %62 = vector.shape_cast %61 : vector<8x32xbf16> to vector<1x8x32xbf16>
    %63 = vector.extract_strided_slice %56 {offsets = [0, 96], sizes = [8, 32], strides = [1, 1]} : vector<8x256xbf16> to vector<8x32xbf16>
    %64 = vector.shape_cast %63 : vector<8x32xbf16> to vector<1x8x32xbf16>
    %65 = vector.extract_strided_slice %56 {offsets = [0, 128], sizes = [8, 32], strides = [1, 1]} : vector<8x256xbf16> to vector<8x32xbf16>
    %66 = vector.shape_cast %65 : vector<8x32xbf16> to vector<1x8x32xbf16>
    %67 = vector.extract_strided_slice %56 {offsets = [0, 160], sizes = [8, 32], strides = [1, 1]} : vector<8x256xbf16> to vector<8x32xbf16>
    %68 = vector.shape_cast %67 : vector<8x32xbf16> to vector<1x8x32xbf16>
    %69 = vector.extract_strided_slice %56 {offsets = [0, 192], sizes = [8, 32], strides = [1, 1]} : vector<8x256xbf16> to vector<8x32xbf16>
    %70 = vector.shape_cast %69 : vector<8x32xbf16> to vector<1x8x32xbf16>
    %71 = vector.extract_strided_slice %56 {offsets = [0, 224], sizes = [8, 32], strides = [1, 1]} : vector<8x256xbf16> to vector<8x32xbf16>
    %72 = vector.shape_cast %71 : vector<8x32xbf16> to vector<1x8x32xbf16>
    %73 = tpu.concatenate %58, %60, %62, %64, %66, %68, %70, %72 in 0 : vector<1x8x32xbf16>, vector<1x8x32xbf16>, vector<1x8x32xbf16>, vector<1x8x32xbf16>, vector<1x8x32xbf16>, vector<1x8x32xbf16>, vector<1x8x32xbf16>, vector<1x8x32xbf16> -> vector<8x8x32xbf16>
    "tpu.trace_start"() <{level = 10 : i32, message = "hqd,hkd->hqk"}> : () -> ()
    %cst_15 = arith.constant dense<0.000000e+00> : vector<8x8x8xf32>
    %74 = tpu.matmul %35, %54, %cst_15 {dimension_numbers = #tpu.dot_dimension_numbers<[2], [2], [1], [1], [0, 0, 0, 1, 1, 1], [0], [0]>} : vector<8x8x32xbf16>, vector<8x8x32xbf16>, vector<8x8x8xf32> -> vector<8x8x8xf32>
    "tpu.trace_stop"() : () -> ()
    %cst_16 = arith.constant dense<0xFF800000> : vector<8x8xf32>
    %75 = vector.multi_reduction <maximumf>, %74, %cst_16 [2] : vector<8x8x8xf32> to vector<8x8xf32>
    %76 = vector.shape_cast %75 : vector<8x8xf32> to vector<8x8x1xf32>
    %77 = vector.broadcast %76 : vector<8x8x1xf32> to vector<8x8x8xf32>
    %78 = arith.subf %74, %77 : vector<8x8x8xf32>
    %79 = math.exp %78 : vector<8x8x8xf32>
    %cst_17 = arith.constant dense<0.000000e+00> : vector<8x8xf32>
    %80 = vector.multi_reduction <add>, %79, %cst_17 [2] : vector<8x8x8xf32> to vector<8x8xf32>
    %81 = vector.shape_cast %80 : vector<8x8xf32> to vector<8x8x1xf32>
    %82 = tpu.reciprocal %81 {approx = true} : vector<8x8x1xf32> -> vector<8x8x1xf32>
    %83 = vector.broadcast %82 : vector<8x8x1xf32> to vector<8x8x8xf32>
    %84 = arith.mulf %79, %83 : vector<8x8x8xf32>
    %85 = arith.truncf %84 : vector<8x8x8xf32> to vector<8x8x8xbf16>
    "tpu.trace_start"() <{level = 10 : i32, message = "hqk,hkd->hqd"}> : () -> ()
    %cst_18 = arith.constant dense<0.000000e+00> : vector<8x8x32xf32>
    %86 = tpu.matmul %85, %73, %cst_18 {dimension_numbers = #tpu.dot_dimension_numbers<[2], [1], [1], [2], [0, 0, 0, 1, 1, 2], [0], [0]>} : vector<8x8x8xbf16>, vector<8x8x32xbf16>, vector<8x8x32xf32> -> vector<8x8x32xf32>
    "tpu.trace_stop"() : () -> ()
    %87 = arith.truncf %86 : vector<8x8x32xf32> to vector<8x8x32xbf16>
    %c0_19 = arith.constant 0 : index
    %c0_20 = arith.constant 0 : index
    %c0_21 = arith.constant 0 : index
    %88 = vector.load %arg8[%c0_19, %c0_20, %c0_21] : memref<8x32x128xbf16, #tpu.memory_space<vmem>>, vector<8x32x128xbf16>
    "tpu.trace_start"() <{level = 10 : i32, message = "hsd,hdo->hso"}> : () -> ()
    %cst_22 = arith.constant dense<0.000000e+00> : vector<8x8x128xf32>
    %89 = tpu.matmul %87, %88, %cst_22 {dimension_numbers = #tpu.dot_dimension_numbers<[2], [1], [1], [2], [0, 0, 0, 1, 1, 2], [0], [0]>} : vector<8x8x32xbf16>, vector<8x32x128xbf16>, vector<8x8x128xf32> -> vector<8x8x128xf32>
    "tpu.trace_stop"() : () -> ()
    %cst_23 = arith.constant dense<0.000000e+00> : vector<8x128xf32>
    %90 = vector.multi_reduction <add>, %89, %cst_23 [0] : vector<8x8x128xf32> to vector<8x128xf32>
    %c0_24 = arith.constant 0 : index
    %c0_25 = arith.constant 0 : index
    %91 = vector.load %arg9[%c0_24, %c0_25] : memref<1x128xf32, #tpu.memory_space<vmem>>, vector<1x128xf32>
    %92 = vector.broadcast %91 : vector<1x128xf32> to vector<8x128xf32>
    %93 = arith.addf %90, %92 : vector<8x128xf32>
    %94 = vector.extract_strided_slice %6 {offsets = [8, 0], sizes = [8, 256], strides = [1, 1]} : vector<16x256xf32> to vector<8x256xf32>
    %95 = arith.truncf %94 : vector<8x256xf32> to vector<8x256xbf16>
    %96 = vector.extract_strided_slice %95 {offsets = [0, 0], sizes = [8, 32], strides = [1, 1]} : vector<8x256xbf16> to vector<8x32xbf16>
    %97 = vector.shape_cast %96 : vector<8x32xbf16> to vector<1x8x32xbf16>
    %98 = vector.extract_strided_slice %95 {offsets = [0, 32], sizes = [8, 32], strides = [1, 1]} : vector<8x256xbf16> to vector<8x32xbf16>
    %99 = vector.shape_cast %98 : vector<8x32xbf16> to vector<1x8x32xbf16>
    %100 = vector.extract_strided_slice %95 {offsets = [0, 64], sizes = [8, 32], strides = [1, 1]} : vector<8x256xbf16> to vector<8x32xbf16>
    %101 = vector.shape_cast %100 : vector<8x32xbf16> to vector<1x8x32xbf16>
    %102 = vector.extract_strided_slice %95 {offsets = [0, 96], sizes = [8, 32], strides = [1, 1]} : vector<8x256xbf16> to vector<8x32xbf16>
    %103 = vector.shape_cast %102 : vector<8x32xbf16> to vector<1x8x32xbf16>
    %104 = vector.extract_strided_slice %95 {offsets = [0, 128], sizes = [8, 32], strides = [1, 1]} : vector<8x256xbf16> to vector<8x32xbf16>
    %105 = vector.shape_cast %104 : vector<8x32xbf16> to vector<1x8x32xbf16>
    %106 = vector.extract_strided_slice %95 {offsets = [0, 160], sizes = [8, 32], strides = [1, 1]} : vector<8x256xbf16> to vector<8x32xbf16>
    %107 = vector.shape_cast %106 : vector<8x32xbf16> to vector<1x8x32xbf16>
    %108 = vector.extract_strided_slice %95 {offsets = [0, 192], sizes = [8, 32], strides = [1, 1]} : vector<8x256xbf16> to vector<8x32xbf16>
    %109 = vector.shape_cast %108 : vector<8x32xbf16> to vector<1x8x32xbf16>
    %110 = vector.extract_strided_slice %95 {offsets = [0, 224], sizes = [8, 32], strides = [1, 1]} : vector<8x256xbf16> to vector<8x32xbf16>
    %111 = vector.shape_cast %110 : vector<8x32xbf16> to vector<1x8x32xbf16>
    %112 = tpu.concatenate %97, %99, %101, %103, %105, %107, %109, %111 in 0 : vector<1x8x32xbf16>, vector<1x8x32xbf16>, vector<1x8x32xbf16>, vector<1x8x32xbf16>, vector<1x8x32xbf16>, vector<1x8x32xbf16>, vector<1x8x32xbf16>, vector<1x8x32xbf16> -> vector<8x8x32xbf16>
    %113 = vector.extract_strided_slice %11 {offsets = [8, 0], sizes = [8, 256], strides = [1, 1]} : vector<16x256xf32> to vector<8x256xf32>
    %114 = arith.truncf %113 : vector<8x256xf32> to vector<8x256xbf16>
    %115 = vector.extract_strided_slice %114 {offsets = [0, 0], sizes = [8, 32], strides = [1, 1]} : vector<8x256xbf16> to vector<8x32xbf16>
    %116 = vector.shape_cast %115 : vector<8x32xbf16> to vector<1x8x32xbf16>
    %117 = vector.extract_strided_slice %114 {offsets = [0, 32], sizes = [8, 32], strides = [1, 1]} : vector<8x256xbf16> to vector<8x32xbf16>
    %118 = vector.shape_cast %117 : vector<8x32xbf16> to vector<1x8x32xbf16>
    %119 = vector.extract_strided_slice %114 {offsets = [0, 64], sizes = [8, 32], strides = [1, 1]} : vector<8x256xbf16> to vector<8x32xbf16>
    %120 = vector.shape_cast %119 : vector<8x32xbf16> to vector<1x8x32xbf16>
    %121 = vector.extract_strided_slice %114 {offsets = [0, 96], sizes = [8, 32], strides = [1, 1]} : vector<8x256xbf16> to vector<8x32xbf16>
    %122 = vector.shape_cast %121 : vector<8x32xbf16> to vector<1x8x32xbf16>
    %123 = vector.extract_strided_slice %114 {offsets = [0, 128], sizes = [8, 32], strides = [1, 1]} : vector<8x256xbf16> to vector<8x32xbf16>
    %124 = vector.shape_cast %123 : vector<8x32xbf16> to vector<1x8x32xbf16>
    %125 = vector.extract_strided_slice %114 {offsets = [0, 160], sizes = [8, 32], strides = [1, 1]} : vector<8x256xbf16> to vector<8x32xbf16>
    %126 = vector.shape_cast %125 : vector<8x32xbf16> to vector<1x8x32xbf16>
    %127 = vector.extract_strided_slice %114 {offsets = [0, 192], sizes = [8, 32], strides = [1, 1]} : vector<8x256xbf16> to vector<8x32xbf16>
    %128 = vector.shape_cast %127 : vector<8x32xbf16> to vector<1x8x32xbf16>
    %129 = vector.extract_strided_slice %114 {offsets = [0, 224], sizes = [8, 32], strides = [1, 1]} : vector<8x256xbf16> to vector<8x32xbf16>
    %130 = vector.shape_cast %129 : vector<8x32xbf16> to vector<1x8x32xbf16>
    %131 = tpu.concatenate %116, %118, %120, %122, %124, %126, %128, %130 in 0 : vector<1x8x32xbf16>, vector<1x8x32xbf16>, vector<1x8x32xbf16>, vector<1x8x32xbf16>, vector<1x8x32xbf16>, vector<1x8x32xbf16>, vector<1x8x32xbf16>, vector<1x8x32xbf16> -> vector<8x8x32xbf16>
    %132 = vector.extract_strided_slice %16 {offsets = [8, 0], sizes = [8, 256], strides = [1, 1]} : vector<16x256xf32> to vector<8x256xf32>
    %133 = arith.truncf %132 : vector<8x256xf32> to vector<8x256xbf16>
    %134 = vector.extract_strided_slice %133 {offsets = [0, 0], sizes = [8, 32], strides = [1, 1]} : vector<8x256xbf16> to vector<8x32xbf16>
    %135 = vector.shape_cast %134 : vector<8x32xbf16> to vector<1x8x32xbf16>
    %136 = vector.extract_strided_slice %133 {offsets = [0, 32], sizes = [8, 32], strides = [1, 1]} : vector<8x256xbf16> to vector<8x32xbf16>
    %137 = vector.shape_cast %136 : vector<8x32xbf16> to vector<1x8x32xbf16>
    %138 = vector.extract_strided_slice %133 {offsets = [0, 64], sizes = [8, 32], strides = [1, 1]} : vector<8x256xbf16> to vector<8x32xbf16>
    %139 = vector.shape_cast %138 : vector<8x32xbf16> to vector<1x8x32xbf16>
    %140 = vector.extract_strided_slice %133 {offsets = [0, 96], sizes = [8, 32], strides = [1, 1]} : vector<8x256xbf16> to vector<8x32xbf16>
    %141 = vector.shape_cast %140 : vector<8x32xbf16> to vector<1x8x32xbf16>
    %142 = vector.extract_strided_slice %133 {offsets = [0, 128], sizes = [8, 32], strides = [1, 1]} : vector<8x256xbf16> to vector<8x32xbf16>
    %143 = vector.shape_cast %142 : vector<8x32xbf16> to vector<1x8x32xbf16>
    %144 = vector.extract_strided_slice %133 {offsets = [0, 160], sizes = [8, 32], strides = [1, 1]} : vector<8x256xbf16> to vector<8x32xbf16>
    %145 = vector.shape_cast %144 : vector<8x32xbf16> to vector<1x8x32xbf16>
    %146 = vector.extract_strided_slice %133 {offsets = [0, 192], sizes = [8, 32], strides = [1, 1]} : vector<8x256xbf16> to vector<8x32xbf16>
    %147 = vector.shape_cast %146 : vector<8x32xbf16> to vector<1x8x32xbf16>
    %148 = vector.extract_strided_slice %133 {offsets = [0, 224], sizes = [8, 32], strides = [1, 1]} : vector<8x256xbf16> to vector<8x32xbf16>
    %149 = vector.shape_cast %148 : vector<8x32xbf16> to vector<1x8x32xbf16>
    %150 = tpu.concatenate %135, %137, %139, %141, %143, %145, %147, %149 in 0 : vector<1x8x32xbf16>, vector<1x8x32xbf16>, vector<1x8x32xbf16>, vector<1x8x32xbf16>, vector<1x8x32xbf16>, vector<1x8x32xbf16>, vector<1x8x32xbf16>, vector<1x8x32xbf16> -> vector<8x8x32xbf16>
    "tpu.trace_start"() <{level = 10 : i32, message = "hqd,hkd->hqk"}> : () -> ()
    %cst_26 = arith.constant dense<0.000000e+00> : vector<8x8x8xf32>
    %151 = tpu.matmul %112, %131, %cst_26 {dimension_numbers = #tpu.dot_dimension_numbers<[2], [2], [1], [1], [0, 0, 0, 1, 1, 1], [0], [0]>} : vector<8x8x32xbf16>, vector<8x8x32xbf16>, vector<8x8x8xf32> -> vector<8x8x8xf32>
    "tpu.trace_stop"() : () -> ()
    %cst_27 = arith.constant dense<0xFF800000> : vector<8x8xf32>
    %152 = vector.multi_reduction <maximumf>, %151, %cst_27 [2] : vector<8x8x8xf32> to vector<8x8xf32>
    %153 = vector.shape_cast %152 : vector<8x8xf32> to vector<8x8x1xf32>
    %154 = vector.broadcast %153 : vector<8x8x1xf32> to vector<8x8x8xf32>
    %155 = arith.subf %151, %154 : vector<8x8x8xf32>
    %156 = math.exp %155 : vector<8x8x8xf32>
    %cst_28 = arith.constant dense<0.000000e+00> : vector<8x8xf32>
    %157 = vector.multi_reduction <add>, %156, %cst_28 [2] : vector<8x8x8xf32> to vector<8x8xf32>
    %158 = vector.shape_cast %157 : vector<8x8xf32> to vector<8x8x1xf32>
    %159 = tpu.reciprocal %158 {approx = true} : vector<8x8x1xf32> -> vector<8x8x1xf32>
    %160 = vector.broadcast %159 : vector<8x8x1xf32> to vector<8x8x8xf32>
    %161 = arith.mulf %156, %160 : vector<8x8x8xf32>
    %162 = arith.truncf %161 : vector<8x8x8xf32> to vector<8x8x8xbf16>
    "tpu.trace_start"() <{level = 10 : i32, message = "hqk,hkd->hqd"}> : () -> ()
    %cst_29 = arith.constant dense<0.000000e+00> : vector<8x8x32xf32>
    %163 = tpu.matmul %162, %150, %cst_29 {dimension_numbers = #tpu.dot_dimension_numbers<[2], [1], [1], [2], [0, 0, 0, 1, 1, 2], [0], [0]>} : vector<8x8x8xbf16>, vector<8x8x32xbf16>, vector<8x8x32xf32> -> vector<8x8x32xf32>
    "tpu.trace_stop"() : () -> ()
    %164 = arith.truncf %163 : vector<8x8x32xf32> to vector<8x8x32xbf16>
    %c0_30 = arith.constant 0 : index
    %c0_31 = arith.constant 0 : index
    %c0_32 = arith.constant 0 : index
    %165 = vector.load %arg8[%c0_30, %c0_31, %c0_32] : memref<8x32x128xbf16, #tpu.memory_space<vmem>>, vector<8x32x128xbf16>
    "tpu.trace_start"() <{level = 10 : i32, message = "hsd,hdo->hso"}> : () -> ()
    %cst_33 = arith.constant dense<0.000000e+00> : vector<8x8x128xf32>
    %166 = tpu.matmul %164, %165, %cst_33 {dimension_numbers = #tpu.dot_dimension_numbers<[2], [1], [1], [2], [0, 0, 0, 1, 1, 2], [0], [0]>} : vector<8x8x32xbf16>, vector<8x32x128xbf16>, vector<8x8x128xf32> -> vector<8x8x128xf32>
    "tpu.trace_stop"() : () -> ()
    %cst_34 = arith.constant dense<0.000000e+00> : vector<8x128xf32>
    %167 = vector.multi_reduction <add>, %166, %cst_34 [0] : vector<8x8x128xf32> to vector<8x128xf32>
    %c0_35 = arith.constant 0 : index
    %c0_36 = arith.constant 0 : index
    %168 = vector.load %arg9[%c0_35, %c0_36] : memref<1x128xf32, #tpu.memory_space<vmem>>, vector<1x128xf32>
    %169 = vector.broadcast %168 : vector<1x128xf32> to vector<8x128xf32>
    %170 = arith.addf %167, %169 : vector<8x128xf32>
    %171 = tpu.concatenate %93, %170 in 0 : vector<8x128xf32>, vector<8x128xf32> -> vector<16x128xf32>
    %c0_37 = arith.constant 0 : index
    %c0_38 = arith.constant 0 : index
    %172 = vector.load %arg10[%c0_37, %c0_38] : memref<16x128xf32, #tpu.memory_space<vmem>>, vector<16x128xf32>
    tpu.vector_store %arg10[%c0_37, %c0_38], %171 {strides = array<i32>} : memref<16x128xf32, #tpu.memory_space<vmem>>, vector<16x128xf32>,
    return
  }
  func.func @transform_0(%arg0: i32) -> (i32, i32) {
    %c0_i32 = arith.constant 0 : i32
    %c0_i32_0 = arith.constant 0 : i32
    %c0_i32_1 = arith.constant 0 : i32
    return %c0_i32, %c0_i32_0 : i32, i32
  }
  func.func @transform_1(%arg0: i32) -> (i32, i32) {
    %c0_i32 = arith.constant 0 : i32
    %c0_i32_0 = arith.constant 0 : i32
    %c0_i32_1 = arith.constant 0 : i32
    return %c0_i32, %c0_i32_0 : i32, i32
  }
  func.func @transform_2(%arg0: i32) -> (i32, i32) {
    %c0_i32 = arith.constant 0 : i32
    %c0_i32_0 = arith.constant 0 : i32
    %c0_i32_1 = arith.constant 0 : i32
    return %c0_i32, %c0_i32_0 : i32, i32
  }
  func.func @transform_3(%arg0: i32) -> (i32, i32) {
    %c0_i32 = arith.constant 0 : i32
    %c0_i32_0 = arith.constant 0 : i32
    %c0_i32_1 = arith.constant 0 : i32
    return %c0_i32, %c0_i32_0 : i32, i32
  }
  func.func @transform_4(%arg0: i32) -> (i32, i32) {
    %c0_i32 = arith.constant 0 : i32
    %c0_i32_0 = arith.constant 0 : i32
    %c0_i32_1 = arith.constant 0 : i32
    return %c0_i32, %c0_i32_0 : i32, i32
  }
  func.func @transform_5(%arg0: i32) -> (i32, i32) {
    %c0_i32 = arith.constant 0 : i32
    %c0_i32_0 = arith.constant 0 : i32
    %c0_i32_1 = arith.constant 0 : i32
    return %c0_i32, %c0_i32_0 : i32, i32
  }
  func.func @transform_6(%arg0: i32) -> (i32, i32) {
    %c0_i32 = arith.constant 0 : i32
    %c0_i32_0 = arith.constant 0 : i32
    %c0_i32_1 = arith.constant 0 : i32
    return %c0_i32, %c0_i32_0 : i32, i32
  }
  func.func @transform_7(%arg0: i32) -> (i32, i32, i32) {
    %c0_i32 = arith.constant 0 : i32
    %c0_i32_0 = arith.constant 0 : i32
    %c0_i32_1 = arith.constant 0 : i32
    %c0_i32_2 = arith.constant 0 : i32
    return %c0_i32, %c0_i32_0, %c0_i32_1 : i32, i32, i32
  }
  func.func @transform_8(%arg0: i32) -> (i32, i32) {
    %c0_i32 = arith.constant 0 : i32
    %c0_i32_0 = arith.constant 0 : i32
    %c0_i32_1 = arith.constant 0 : i32
    return %c0_i32, %c0_i32_0 : i32, i32
  }
  func.func @transform_9(%arg0: i32) -> (i32, i32) {
    %c0_i32 = arith.constant 0 : i32
    %c0_i32_0 = arith.constant 0 : i32
    %c0_i32_1 = arith.constant 0 : i32
    return %c0_i32, %c0_i32_0 : i32, i32
  }
}

</mosaic_0001>

<bundles_post_ra>
// kernel: tpu_custom_call.1
= control target key start
LH: loop header
LB: loop body
LE: loop exit
PB: predicated region body
PF: predicated region fallthrough
CT: control target
= control target key end

     0   :  { %14 = vsyncpa [#allocation3], 0  ;;  %s4848_s0 = inlined_call_operand.hbm [shape: f32[16,128], index: 0, kind: input, shape index: {}]   ;;  %s4849_s1 = inlined_call_operand.hbm [shape: bf16[128,256], index: 1, kind: input, shape index: {}]   ;;  %s4850_s2 = inlined_call_operand.hbm [shape: bf16[128,256], index: 2, kind: input, shape index: {}]   ;;  %s4851_s3 = inlined_call_operand.hbm [shape: bf16[128,256], index: 3, kind: input, shape index: {}]   ;;  %s4852_s4 = inlined_call_operand.vmem [shape: f32[1,256], index: 4, kind: input, shape index: {}]   ;;  %s4853_s5 = inlined_call_operand.vmem [shape: f32[1,256], index: 5, kind: input, shape index: {}]   ;;  %s4854_s6 = inlined_call_operand.vmem [shape: f32[1,256], index: 6, kind: input, shape index: {}]   ;;  %s4855_s7 = inlined_call_operand.hbm [shape: bf16[8,32,128], index: 7, kind: input, shape index: {}]   ;;  %s4856_s8 = inlined_call_operand.vmem [shape: f32[1,128], index: 8, kind: input, shape index: {}]   ;;  %s4857_s9 = inlined_call_operand.hbm [shape: f32[16,128], index: 9, kind: output, shape index: {}]  }
   0x1   :  { %15 = vsyncpa [#allocation6], 0 }
   0x2   :  { %16 = vsyncpa [#allocation9], 0 }
   0x3   :  { %17 = vsyncpa [#allocation4], 0  ;;  %s4217_s30 = smov [#allocation5]   ;;  %s4218_s11 = smov [#allocation8]  }
   0x4   :  { %s35_s10 = sshll.u32 %s4217_s30, 4  ;;  %s59_s12 = sshll.u32 %s4218_s11, 4  ;;  %s36_s10 = int_to_ptr.vmem [resolvable:$true] %s35_s10  ;;  %s4282_s12 = int_to_ptr.vmem [resolvable:$true] %s59_s12 }
   0x5   :  { %s4077_s15 = scalar_lea.hbm %s4849_s1, 2048 }
   0x6   :  { %p4078_p0 = scmp.ne.s32.totalorder %s4849_s1, %s4077_s15  ;;  %p4081_p1 = scmp.lt.u32.totalorder %s4077_s15, %s4849_s1 }
   0x8   :  { %p4083_p2 = pnand %p4081_p1, %p4078_p0 }
   0xa   :  { %4086 = shalt.err (!%p4083_p2)
}
   0xb   :  { %s4087_s20 = scalar_lea.vmem %s36_s10, 2048  ;;  %p4092_p4 = scmp.lt.s32.totalorder %s36_s10, %s36_s10 }
   0xc   :  { %p4088_p3 = scmp.ne.s32.totalorder %s36_s10, %s4087_s20  ;;  %p4093_p5 = scmp.lt.s32.totalorder %s4087_s20, %s4087_s20 }
   0xe   :  { %p4094_p6 = por %p4093_p5, %p4092_p4 }
  0x10   :  { %p4095_p7 = pnand %p4094_p6, %p4088_p3 }
  0x12   :  { %4098 = shalt.err (!%p4095_p7)
}
  0x13   :  { %s4219_s21 = smov 128   ;;  %s4220_s22 = smov 8  }
  0x14   :  { %41 = dma.hbm_to_vmem [thread:$0]  %s4849_s1, 2048, %s36_s10, [#allocation6], %s4219_s21, %s4219_s21, %s4220_s22  }
  0x15   :  { %s4099_s27 = scalar_lea.hbm %s4851_s3, 2048 }
  0x16   :  { %p4100_p8 = scmp.ne.s32.totalorder %s4851_s3, %s4099_s27  ;;  %p4103_p9 = scmp.lt.u32.totalorder %s4099_s27, %s4851_s3 }
  0x18   :  { %p4105_p10 = pnand %p4103_p9, %p4100_p8 }
  0x1a   :  { %4108 = shalt.err (!%p4105_p10)
}
  0x1b   :  { %s4109_s13 = scalar_lea.vmem %s4282_s12, 2048  ;;  %p4114_p12 = scmp.lt.s32.totalorder %s4282_s12, %s4282_s12 }
  0x1c   :  { %p4110_p11 = scmp.ne.s32.totalorder %s4282_s12, %s4109_s13  ;;  %p4115_p13 = scmp.lt.s32.totalorder %s4109_s13, %s4109_s13 }
  0x1e   :  { %p4116_p0 = por %p4115_p13, %p4114_p12 }
  0x20   :  { %p4117_p1 = pnand %p4116_p0, %p4110_p11 }
  0x22   :  { %4120 = shalt.err (!%p4117_p1)
}
  0x23   :  { %65 = dma.hbm_to_vmem [thread:$0]  %s4851_s3, 2048, %s4282_s12, [#allocation9], %s4219_s21, %s4219_s21, %s4220_s22  }
  0x24   :  { %s4221_s14 = smov [#allocation2]   ;;  %s4222_s16 = smov [#allocation7]  }
  0x25   :  { %s23_s15 = sshll.u32 %s4221_s14, 4  ;;  %s47_s17 = sshll.u32 %s4222_s16, 4  ;;  %s24_s15 = int_to_ptr.vmem [resolvable:$true] %s23_s15  ;;  %s4319_s17 = int_to_ptr.vmem [resolvable:$true] %s47_s17 }
  0x26   :  { %s4121_s20 = scalar_lea.hbm %s4848_s0, 256 }
  0x27   :  { %p4122_p2 = scmp.ne.s32.totalorder %s4848_s0, %s4121_s20  ;;  %p4125_p3 = scmp.lt.u32.totalorder %s4121_s20, %s4848_s0 }
  0x29   :  { %p4127_p4 = pnand %p4125_p3, %p4122_p2 }
  0x2b   :  { %4130 = shalt.err (!%p4127_p4)
}
  0x2c   :  { %s4131_s3 = scalar_lea.vmem %s24_s15, 256  ;;  %p4136_p6 = scmp.lt.s32.totalorder %s24_s15, %s24_s15 }
  0x2d   :  { %p4132_p5 = scmp.ne.s32.totalorder %s24_s15, %s4131_s3  ;;  %p4137_p7 = scmp.lt.s32.totalorder %s4131_s3, %s4131_s3 }
  0x2f   :  { %p4138_p8 = por %p4137_p7, %p4136_p6 }
  0x31   :  { %p4139_p9 = pnand %p4138_p8, %p4132_p5 }
  0x33   :  { %4142 = shalt.err (!%p4139_p9)
}
  0x34   :  { %29 = dma.hbm_to_vmem [thread:$0]  %s4848_s0, 256, %s24_s15, [#allocation3], %s4219_s21, %s4219_s21, %s4220_s22  }
  0x35   :  { %s4143_s30 = scalar_lea.hbm %s4850_s2, 2048 }
  0x36   :  { %p4144_p10 = scmp.ne.s32.totalorder %s4850_s2, %s4143_s30  ;;  %p4147_p11 = scmp.lt.u32.totalorder %s4143_s30, %s4850_s2 }
  0x38   :  { %p4149_p12 = pnand %p4147_p11, %p4144_p10 }
  0x3a   :  { %4152 = shalt.err (!%p4149_p12)
}
  0x3b   :  { %s4153_s14 = scalar_lea.vmem %s4319_s17, 2048  ;;  %p4158_p0 = scmp.lt.s32.totalorder %s4319_s17, %s4319_s17 }
  0x3c   :  { %p4154_p13 = scmp.ne.s32.totalorder %s4319_s17, %s4153_s14  ;;  %p4159_p1 = scmp.lt.s32.totalorder %s4153_s14, %s4153_s14 }
  0x3e   :  { %p4160_p2 = por %p4159_p1, %p4158_p0 }
  0x40   :  { %p4161_p3 = pnand %p4160_p2, %p4154_p13 }
  0x42   :  { %4164 = shalt.err (!%p4161_p3)
}
  0x43   :  { %53 = dma.hbm_to_vmem [thread:$0]  %s4850_s2, 2048, %s4319_s17, [#allocation6], %s4219_s21, %s4219_s21, %s4220_s22  }
  0x44   :  { %s4223_s16 = smov [#allocation10]   ;;  %s4165_s23 = scalar_lea.hbm %s4855_s7, 2048 }
  0x45   :  { %s77_s18 = sshll.u32 %s4223_s16, 4  ;;  %p4166_p4 = scmp.ne.s32.totalorder %s4855_s7, %s4165_s23  ;;  %s78_s18 = int_to_ptr.vmem [resolvable:$true] %s77_s18 }
  0x46   :  { %p4169_p5 = scmp.lt.u32.totalorder %s4165_s23, %s4855_s7 }
  0x48   :  { %p4171_p6 = pnand %p4169_p5, %p4166_p4 }
  0x4a   :  { %4174 = shalt.err (!%p4171_p6)
}
  0x4b   :  { %s4175_s12 = scalar_lea.vmem %s78_s18, 2048  ;;  %p4180_p8 = scmp.lt.s32.totalorder %s78_s18, %s78_s18 }
  0x4c   :  { %p4176_p7 = scmp.ne.s32.totalorder %s78_s18, %s4175_s12  ;;  %p4181_p9 = scmp.lt.s32.totalorder %s4175_s12, %s4175_s12 }
  0x4e   :  { %p4182_p10 = por %p4181_p9, %p4180_p8 }
  0x50   :  { %p4183_p11 = pnand %p4182_p10, %p4176_p7 }
  0x52   :  { %4186 = shalt.err (!%p4183_p11)
}
  0x53   :  { %s4224_s2 = smov 64   ;;  %s4225_s17 = smov 4  }
  0x54   :  { %83 = dma.hbm_to_vmem [thread:$0]  %s4855_s7, 2048, %s78_s18, [#allocation9], %s4224_s2, %s4224_s2, %s4225_s17  }
  0x55   :  { %4209 = dma.done.wait [#allocation3], 256  }
  0x56   :  { %4210 = vsyncadd [#allocation3], 4294967040 }
  0x57   :  { %4211 = dma.done.wait [#allocation6], 4096  }
  0x58   :  { %4212 = vsyncadd [#allocation6], 4294963200 }
  0x59   :  { %4213 = dma.done.wait [#allocation9], 4096  }
  0x5a   :  { %4214 = vsyncadd [#allocation9], 4294963200  ;;  %v4226_v0 = vmov 0   ;;  %v3909_v1 = vld [vmem:[#allocation7 + $0x4] ss:$8 sps:$4 sm:$0xff]   ;;  %v102_v32 = vld [vmem:[#allocation2] sm:$0xff]  ;;  %v123_v53 = vlaneseq }
  0x5b   :  { %396 = vmatprep.mubr.bf16.mxu1 %v4226_v0  ;;  %245 = vmatprep.mubr.bf16.mxu0 %v4226_v0  ;;  %v3911_v2 = vld [vmem:[#allocation7] ss:$8 sps:$4 sm:$0xff]   ;;  %v3912_v3 = vld [vmem:[#allocation5 + $0x4] ss:$8 sps:$4 sm:$0xff]   ;;  %v3914_v4 = vld [vmem:[#allocation7 + $0x14] ss:$8 sps:$4 sm:$0xff]  }
  0x5c   :  { %364 = vmatprep.subr.bf16.mxu1 %v3909_v1  ;;  %v3916_v5 = vld [vmem:[#allocation5] ss:$8 sps:$4 sm:$0xff]   ;;  %v3917_v6 = vld [vmem:[#allocation7 + $0x10] ss:$8 sps:$4 sm:$0xff]   ;;  %213 = vmatprep.subr.bf16.mxu0 %v3912_v3  ;;  %v3918_v7 = vld [vmem:[#allocation5 + $0x14] ss:$8 sps:$4 sm:$0xff]  }
  0x5d   :  { %365 = vmatpush1.bf16.msra.mxu1 %v3911_v2  ;;  %214 = vmatpush1.bf16.msra.mxu0 %v3916_v5  ;;  %v3920_v8 = vld [vmem:[#allocation7 + $0x24] ss:$8 sps:$4 sm:$0xff]   ;;  %v3922_v9 = vld [vmem:[#allocation5 + $0x10] ss:$8 sps:$4 sm:$0xff]   ;;  %v3923_v10 = vld [vmem:[#allocation7 + $0x20] ss:$8 sps:$4 sm:$0xff]  }
  0x5e   :  { %366 = vmatprep.subr.bf16.mxu1 %v3914_v4  ;;  %215 = vmatprep.subr.bf16.mxu0 %v3918_v7  ;;  %v3924_v11 = vld [vmem:[#allocation5 + $0x24] ss:$8 sps:$4 sm:$0xff]   ;;  %v3926_v12 = vld [vmem:[#allocation7 + $0x34] ss:$8 sps:$4 sm:$0xff]   ;;  %v3928_v13 = vld [vmem:[#allocation5 + $0x20] ss:$8 sps:$4 sm:$0xff]  }
  0x5f   :  { %v3930_v14 = vld [vmem:[#allocation5 + $0x34] ss:$8 sps:$4 sm:$0xff]   ;;  %v3929_v15 = vld [vmem:[#allocation7 + $0x30] ss:$8 sps:$4 sm:$0xff]   ;;  %v3932_v16 = vld [vmem:[#allocation7 + $0x44] ss:$8 sps:$4 sm:$0xff]  }
  0x60   :  { %v3934_v17 = vld [vmem:[#allocation5 + $0x30] ss:$8 sps:$4 sm:$0xff]   ;;  %v3936_v18 = vld [vmem:[#allocation5 + $0x44] ss:$8 sps:$4 sm:$0xff]   ;;  %v3935_v19 = vld [vmem:[#allocation7 + $0x40] ss:$8 sps:$4 sm:$0xff]  }
  0x61   :  { %367 = vmatpush1.bf16.msra.mxu1 %v3917_v6  ;;  %216 = vmatpush1.bf16.msra.mxu0 %v3922_v9  ;;  %v3938_v20 = vld [vmem:[#allocation7 + $0x54] ss:$8 sps:$4 sm:$0xff]   ;;  %v3940_v21 = vld [vmem:[#allocation5 + $0x40] ss:$8 sps:$4 sm:$0xff]   ;;  %v3941_v23 = vld [vmem:[#allocation7 + $0x50] ss:$8 sps:$4 sm:$0xff]  }
  0x62   :  { %368 = vmatprep.subr.bf16.mxu1 %v3920_v8  ;;  %217 = vmatprep.subr.bf16.mxu0 %v3924_v11  ;;  %v3942_v22 = vld [vmem:[#allocation5 + $0x54] ss:$8 sps:$4 sm:$0xff]   ;;  %v3944_v24 = vld [vmem:[#allocation7 + $0x64] ss:$8 sps:$4 sm:$0xff]   ;;  %v3946_v25 = vld [vmem:[#allocation5 + $0x50] ss:$8 sps:$4 sm:$0xff]  }
  0x63   :  { %v3948_v26 = vld [vmem:[#allocation5 + $0x64] ss:$8 sps:$4 sm:$0xff]   ;;  %v3947_v27 = vld [vmem:[#allocation7 + $0x60] ss:$8 sps:$4 sm:$0xff]   ;;  %v3950_v28 = vld [vmem:[#allocation7 + $0x74] ss:$8 sps:$4 sm:$0xff]  }
  0x64   :  { %v3952_v29 = vld [vmem:[#allocation5 + $0x60] ss:$8 sps:$4 sm:$0xff]   ;;  %v3953_v30 = vld [vmem:[#allocation7 + $0x70] ss:$8 sps:$4 sm:$0xff]   ;;  %v3954_v31 = vld [vmem:[#allocation5 + $0x74] ss:$8 sps:$4 sm:$0xff]  }
  0x65   :  { %369 = vmatpush1.bf16.msra.mxu1 %v3923_v10  ;;  %218 = vmatpush1.bf16.msra.mxu0 %v3928_v13  ;;  %v103_v33 = vld [vmem:[#allocation2 + $0x8] sm:$0xff]  ;;  %v3959_v36 = vld [vmem:[#allocation8 + $0x4] ss:$8 sps:$4 sm:$0xff]   ;;  %v3957_v37 = vld [vmem:[#allocation8] ss:$8 sps:$4 sm:$0xff]   ;;  %v4227_v52 = vmov 0.0  }
  0x66   :  { %370 = vmatprep.subr.bf16.mxu1 %v3926_v12  ;;  %219 = vmatprep.subr.bf16.mxu0 %v3930_v14  ;;  %v3956_v34 = vld [vmem:[#allocation5 + $0x70] ss:$8 sps:$4 sm:$0xff]   ;;  %v104_v35 = vpack.c.bf16 %v103_v33, %v102_v32  ;;  %v3962_v38 = vld [vmem:[#allocation8 + $0x14] ss:$8 sps:$4 sm:$0xff]   ;;  %v3965_v40 = vld [vmem:[#allocation8 + $0x24] ss:$8 sps:$4 sm:$0xff]  }
  0x67   :  { %v3960_v39 = vld [vmem:[#allocation8 + $0x10] ss:$8 sps:$4 sm:$0xff]   ;;  %v3963_v41 = vld [vmem:[#allocation8 + $0x20] ss:$8 sps:$4 sm:$0xff]   ;;  %v3968_v42 = vld [vmem:[#allocation8 + $0x34] ss:$8 sps:$4 sm:$0xff]  }
  0x68   :  { %v3966_v43 = vld [vmem:[#allocation8 + $0x30] ss:$8 sps:$4 sm:$0xff]   ;;  %v3971_v44 = vld [vmem:[#allocation8 + $0x44] ss:$8 sps:$4 sm:$0xff]   ;;  %v3969_v45 = vld [vmem:[#allocation8 + $0x40] ss:$8 sps:$4 sm:$0xff]  }
  0x69   :  { %371 = vmatpush1.bf16.msra.mxu1 %v3929_v15  ;;  %220 = vmatpush1.bf16.msra.mxu0 %v3934_v17  ;;  %v3974_v46 = vld [vmem:[#allocation8 + $0x54] ss:$8 sps:$4 sm:$0xff]   ;;  %v3972_v47 = vld [vmem:[#allocation8 + $0x50] ss:$8 sps:$4 sm:$0xff]   ;;  %v3977_v48 = vld [vmem:[#allocation8 + $0x64] ss:$8 sps:$4 sm:$0xff]  }
  0x6a   :  { %372 = vmatprep.subr.bf16.mxu1 %v3932_v16  ;;  %221 = vmatprep.subr.bf16.mxu0 %v3936_v18  ;;  %v3975_v49 = vld [vmem:[#allocation8 + $0x60] ss:$8 sps:$4 sm:$0xff]   ;;  %v3980_v50 = vld [vmem:[#allocation8 + $0x74] ss:$8 sps:$4 sm:$0xff]   ;;  %v3978_v51 = vld [vmem:[#allocation8 + $0x70] ss:$8 sps:$4 sm:$0xff]  }
  0x6b   :  { %vm4228_vm0 = vmmov 0   ;;  %v124_v54 = vshrl.u32 %v123_v53, 7  ;;  %v272_v56 = vld [vmem:[%s4853_s5] sm:$0x3]  ;;  %vm606_vm1 = vcmask 261120   ;;  %s4230_s5 = smov 32  }
  0x6c   :  { %v121_v58 = vld [vmem:[%s4852_s4] sm:$0x3]  ;;  %s4229_s4 = smov 96   ;;  %vm1075_vm2 = vcmask 1043456   ;;  %vm975_vm3 = vcmask 64512  }
  0x6d   :  { %373 = vmatpush1.bf16.msra.mxu1 %v3935_v19  ;;  %222 = vmatpush1.bf16.msra.mxu0 %v3940_v21  ;;  %v125_v55 = vsub.s32 0, %v124_v54  ;;  %v129_v57 = vsub.s32 1, %v124_v54  ;;  %v423_v21 = vld [vmem:[%s4854_s6] sm:$0x3] }
  0x6e   :  { %374 = vmatprep.subr.bf16.mxu1 %v3938_v20  ;;  %223 = vmatprep.subr.bf16.mxu0 %v3942_v22 }
  0x6f   :  { %v277_v59 = vrot.slane %v272_v56, %v125_v55  ;;  %v281_v60 = vrot.slane %v272_v56, %v129_v57  ;;  %v126_v61 = vrot.slane %v121_v58, %v125_v55  ;;  %v130_v4 = vrot.slane %v121_v58, %v129_v57 }
  0x70   :  { %v428_v22 = vrot.slane %v423_v21, %v125_v55 }
  0x71   :  { %375 = vmatpush1.bf16.msra.mxu1 %v3941_v23  ;;  %224 = vmatpush1.bf16.msra.mxu0 %v3946_v25  ;;  %v432_v23 = vrot.slane %v423_v21, %v129_v57 }
  0x72   :  { %376 = vmatprep.subr.bf16.mxu1 %v3944_v24  ;;  %225 = vmatprep.subr.bf16.mxu0 %v3948_v26 }
  0x75   :  { %377 = vmatpush1.bf16.msra.mxu1 %v3947_v27  ;;  %226 = vmatpush1.bf16.msra.mxu0 %v3952_v29 }
  0x76   :  { %378 = vmatprep.subr.bf16.mxu1 %v3950_v28  ;;  %227 = vmatprep.subr.bf16.mxu0 %v3954_v31 }
  0x79   :  { %379 = vmatpush1.bf16.msra.mxu1 %v3953_v30  ;;  %228 = vmatpush1.bf16.msra.mxu0 %v3956_v34 }
  0x7a   :  { %515 = vmatprep.subr.bf16.mxu0 %v3959_v36  ;;  %3574 = vmatprep.subr.bf16.mxu1 %v4227_v52 }
  0x7c   :  { %397 = vmatmul.mubr.bf16.vlgmr.msra.gmra.mrb[0].mxu1 %v104_v35  ;;  %246 = vmatmul.mubr.bf16.vlgmr.msra.gmra.mrb[0].mxu0 %v104_v35 }
  0x7d   :  { %516 = vmatpush1.bf16.msra.mxu0 %v3957_v37  ;;  %547 = vmatprep.mubr.bf16.mxu0 %v4226_v0 }
  0x7e   :  { %517 = vmatprep.subr.bf16.mxu0 %v3962_v38  ;;  %3576 = vmatprep.mubr.msk.bf16.mxu1 %vm4228_vm0, %v4227_v52 }
  0x81   :  { %518 = vmatpush1.bf16.msra.mxu0 %v3960_v39 }
  0x82   :  { %519 = vmatprep.subr.bf16.mxu0 %v3965_v40 }
  0x85   :  { %520 = vmatpush1.bf16.msra.mxu0 %v3963_v41 }
  0x86   :  { %521 = vmatprep.subr.bf16.mxu0 %v3968_v42 }
  0x89   :  { %522 = vmatpush1.bf16.msra.mxu0 %v3966_v43 }
  0x8a   :  { %523 = vmatprep.subr.bf16.mxu0 %v3971_v44 }
  0x8d   :  { %524 = vmatpush1.bf16.msra.mxu0 %v3969_v45 }
  0x8e   :  { %525 = vmatprep.subr.bf16.mxu0 %v3974_v46 }
  0x91   :  { %526 = vmatpush1.bf16.msra.mxu0 %v3972_v47 }
  0x92   :  { %527 = vmatprep.subr.bf16.mxu0 %v3977_v48 }
  0x95   :  { %528 = vmatpush1.bf16.msra.mxu0 %v3975_v49 }
  0x96   :  { %529 = vmatprep.subr.bf16.mxu0 %v3980_v50 }
  0x99   :  { %530 = vmatpush1.bf16.msra.mxu0 %v3978_v51 }
  0x9a   :  { %3598 = vmatprep.subr.bf16.mxu0 %v4227_v52 }
  0x9c   :  { %548 = vmatmul.mubr.bf16.vlgmr.msra.gmra.mrb[4].mxu0 %v104_v35 }
  0x9d   :  { %3600 = vmatprep.mubr.msk.bf16.mxu0 %vm4228_vm0, %v4227_v52 }
 0x14f   :  { %v398_v62 = vpop.f32.mrb[0].mxu1  ;;  %v247_v3 = vpop.f32.mrb[0].mxu0 }
 0x150   :  { %v399_v63 = vadd.f32 %v398_v62, %v277_v59  ;;  %v400_v0 = vpop.f32.mrb[1].mxu1  ;;  %v248_v8 = vadd.f32 %v247_v3, %v126_v61  ;;  %v249_v9 = vpop.f32.mrb[1].mxu0 }
 0x151   :  { %v401_v1 = vadd.f32 %v400_v0, %v281_v60  ;;  %v402_v2 = vpop.f32.mrb[2].mxu1  ;;  %v251_v12 = vpop.f32.mrb[2].mxu0  ;;  %v250_v17 = vadd.f32 %v249_v9, %v130_v4 }
 0x152   :  { %v574_v5 = vpack.c.bf16 %v399_v63, %v399_v63  ;;  %v4385_v6 = vadd.f32 %v402_v2, %v277_v59  ;;  %v404_v7 = vpop.f32.mrb[3].mxu1  ;;  %v558_v13 = vpack.c.bf16 %v248_v8, %v248_v8  ;;  %v4392_v15 = vadd.f32 %v251_v12, %v126_v61  ;;  %v253_v16 = vpop.f32.mrb[3].mxu0 }
 0x153   :  { %v575_v10 = vpack.c.bf16 %v401_v1, %v401_v1  ;;  %v4387_v11 = vadd.f32 %v404_v7, %v281_v60  ;;  %v4395_v19 = vadd.f32 %v253_v16, %v130_v4  ;;  %v559_v20 = vpack.c.bf16 %v250_v17, %v250_v17 }
 0x154   :  { %579 = vrot.lane.b32.xlu1 %v574_v5, %s4224_s2  ;;  %577 = vrot.lane.b32.xlu0 %v574_v5, %s4229_s4  ;;  %v611_v14 = vsel %vm606_vm1, %v574_v5, 0 }
 0x155   :  { %3575 = vmatpush3.bf16.xpose.msra.mxu1 %v611_v14  ;;  %v795_v18 = vsel %vm606_vm1, %v575_v10, 0 }
 0x156   :  { %3599 = vmatpush3.bf16.xpose.msra.mxu0 %v795_v18  ;;  %3580 = vmatprep.subr.bf16.mxu1 %v4227_v52 }
 0x157   :  { %3610 = vmatprep.subr.bf16.mxu0 %v4227_v52 }
 0x158   :  { %563 = vrot.lane.b32.xlu1 %v558_v13, %s4224_s2  ;;  %561 = vrot.lane.b32.xlu0 %v558_v13, %s4229_s4 }
 0x15c   :  { %565 = vrot.lane.b32.xlu1 %v558_v13, %s4230_s5  ;;  %581 = vrot.lane.b32.xlu0 %v574_v5, %s4230_s5 }
 0x15d   :  { %3577 = vmatmul.mubr.msk.bf16.vlgmr.msra.gmra.mrb[4].mxu1 %vm606_vm1, %v558_v13  ;;  %3601 = vmatmul.mubr.msk.bf16.vlgmr.msra.gmra.mrb[8].mxu0 %vm606_vm1, %v559_v20 }
 0x15e   :  { %3582 = vmatprep.mubr.msk.bf16.mxu1 %vm4228_vm0, %v4227_v52  ;;  %3612 = vmatprep.mubr.msk.bf16.mxu0 %vm4228_vm0, %v4227_v52 }
 0x160   :  { %568 = vrot.lane.b32.xlu1 %v559_v20, %s4229_s4  ;;  %584 = vrot.lane.b32.xlu0 %v575_v10, %s4229_s4 }
 0x164   :  { %588 = vrot.lane.b32.xlu1 %v575_v10, %s4230_s5  ;;  %586 = vrot.lane.b32.xlu0 %v575_v10, %s4224_s2 }
 0x168   :  { %572 = vrot.lane.b32.xlu1 %v559_v20, %s4230_s5  ;;  %570 = vrot.lane.b32.xlu0 %v559_v20, %s4224_s2 }
 0x16f   :  { %v549_v24 = vpop.f32.mrb[4].mxu0 }
 0x170   :  { %v551_v25 = vpop.f32.mrb[5].mxu0  ;;  %v550_v49 = vadd.f32 %v549_v24, %v428_v22 }
 0x171   :  { %v4418_v26 = vadd.f32 %v551_v25, %v432_v23  ;;  %v553_v27 = vpop.f32.mrb[6].mxu0 }
 0x172   :  { %v4420_v28 = vadd.f32 %v553_v27, %v428_v22  ;;  %v555_v29 = vpop.f32.mrb[7].mxu0  ;;  %v4454_v50 = vpack.c.bf16 %v550_v49, %v550_v49 }
 0x173   :  { %v4422_v30 = vadd.f32 %v555_v29, %v432_v23 }
 0x174   :  { %v1077_v51 = vsel %vm1075_vm2, %v4454_v50, 0 }
 0x1c6   :  { %v578_v31 = vpop.permute.xlu0 %577  ;;  %v580_v34 = vpop.permute.xlu1 %579 }
 0x1c7   :  { %v657_v32 = vsel %vm606_vm1, %v578_v31, 0  ;;  %v703_v36 = vsel %vm606_vm1, %v580_v34, 0 }
 0x1c8   :  { %3581 = vmatpush3.bf16.xpose.msra.mxu1 %v657_v32 }
 0x1c9   :  { %3586 = vmatprep.subr.bf16.mxu1 %v4227_v52 }
 0x1ca   :  { %v562_v33 = vpop.permute.xlu0 %561  ;;  %v564_v37 = vpop.permute.xlu1 %563 }
 0x1ce   :  { %v582_v35 = vpop.permute.xlu0 %581  ;;  %v566_v42 = vpop.permute.xlu1 %565 }
 0x1cf   :  { %3583 = vmatmul.mubr.msk.bf16.vlgmr.msra.gmra.mrb[8].mxu1 %vm606_vm1, %v562_v33  ;;  %v749_v40 = vsel %vm606_vm1, %v582_v35, 0 }
 0x1d0   :  { %3587 = vmatpush3.bf16.xpose.msra.mxu1 %v703_v36  ;;  %3588 = vmatprep.mubr.msk.bf16.mxu1 %vm4228_vm0, %v4227_v52 }
 0x1d1   :  { %3592 = vmatprep.subr.bf16.mxu1 %v4227_v52 }
 0x1d2   :  { %v585_v38 = vpop.permute.xlu0 %584  ;;  %v569_v43 = vpop.permute.xlu1 %568 }
 0x1d3   :  { %v841_v45 = vsel %vm606_vm1, %v585_v38, 0 }
 0x1d6   :  { %v587_v39 = vpop.permute.xlu0 %586  ;;  %v589_v46 = vpop.permute.xlu1 %588 }
 0x1d7   :  { %v887_v41 = vsel %vm606_vm1, %v587_v39, 0  ;;  %3589 = vmatmul.mubr.msk.bf16.vlgmr.msra.gmra.mrb[12].mxu1 %vm606_vm1, %v564_v37  ;;  %v933_v47 = vsel %vm606_vm1, %v589_v46, 0 }
 0x1d8   :  { %3593 = vmatpush3.bf16.xpose.msra.mxu1 %v749_v40  ;;  %3611 = vmatpush3.bf16.xpose.msra.mxu0 %v887_v41 }
 0x1d9   :  { %3594 = vmatprep.mubr.msk.bf16.mxu1 %vm4228_vm0, %v4227_v52  ;;  %3604 = vmatprep.subr.bf16.mxu1 %v4227_v52 }
 0x1da   :  { %3622 = vmatprep.subr.bf16.mxu0 %v4227_v52  ;;  %v571_v44 = vpop.permute.xlu0 %570  ;;  %v573_v48 = vpop.permute.xlu1 %572 }
 0x1df   :  { %3595 = vmatmul.mubr.msk.bf16.vlgmr.msra.gmra.mrb[16].mxu1 %vm606_vm1, %v566_v42  ;;  %3613 = vmatmul.mubr.msk.bf16.vlgmr.msra.gmra.mrb[12].mxu0 %vm606_vm1, %v571_v44 }
 0x1e0   :  { %3605 = vmatpush3.bf16.xpose.msra.mxu1 %v841_v45  ;;  %3606 = vmatprep.mubr.msk.bf16.mxu1 %vm4228_vm0, %v4227_v52 }
 0x1e1   :  { %3616 = vmatprep.subr.bf16.mxu1 %v4227_v52  ;;  %3624 = vmatprep.mubr.msk.bf16.mxu0 %vm4228_vm0, %v4227_v52 }
 0x1e2   :  { %3623 = vmatpush3.bf16.msra.mxu0 %v1077_v51 }
 0x1e3   :  { %3634 = vmatprep.subr.bf16.mxu0 %v4227_v52 }
 0x1e7   :  { %3607 = vmatmul.mubr.msk.bf16.vlgmr.msra.gmra.mrb[20].mxu1 %vm606_vm1, %v569_v43 }
 0x1e8   :  { %3617 = vmatpush3.bf16.xpose.msra.mxu1 %v933_v47  ;;  %3618 = vmatprep.mubr.msk.bf16.mxu1 %vm4228_vm0, %v4227_v52 }
 0x1e9   :  { %3628 = vmatprep.subr.bf16.mxu1 %v4227_v52 }
 0x1ef   :  { %3619 = vmatmul.mubr.msk.bf16.vlgmr.msra.gmra.mrb[24].mxu1 %vm606_vm1, %v573_v48 }
 0x1f0   :  { %3630 = vmatprep.mubr.msk.bf16.mxu1 %vm4228_vm0, %v4227_v52 }
 0x230   :  { %v647_v53 = vpop.f32.mrb[4].mxu1  ;;  %v831_v54 = vpop.f32.mrb[8].mxu0 }
 0x231   :  { %v3578_v55 = vpop.f32.mrb[5].mxu1  ;;  %v3602_v56 = vpop.f32.mrb[9].mxu0  ;;  %v976_v57 = vsel %vm975_vm3, %v647_v53, -inf  ;;  %v988_v3 = vsel %vm975_vm3, %v831_v54, -inf }
 0x232   :  { %977 = vmax.xlane.f32.xlu0 %v976_v57  ;;  %v650_v58 = vpop.f32.mrb[6].mxu1  ;;  %v834_v59 = vpop.f32.mrb[10].mxu0 }
 0x233   :  { %v3579_v60 = vpop.f32.mrb[7].mxu1  ;;  %v3603_v61 = vpop.f32.mrb[11].mxu0 }
 0x2a2   :  { %v693_v62 = vpop.f32.mrb[8].mxu1 }
 0x2a3   :  { %v3584_v63 = vpop.f32.mrb[9].mxu1  ;;  %v979_v0 = vsel %vm975_vm3, %v693_v62, -inf }
 0x2a4   :  { %980 = vmax.xlane.f32.xlu1 %v979_v0  ;;  %v696_v1 = vpop.f32.mrb[10].mxu1 }
 0x2a5   :  { %v3585_v2 = vpop.f32.mrb[11].mxu1 }
 0x2a8   :  { %989 = vmax.xlane.f32.xlu1 %v988_v3 }
 0x2aa   :  { %v739_v4 = vpop.f32.mrb[12].mxu1 }
 0x2ab   :  { %v3590_v5 = vpop.f32.mrb[13].mxu1  ;;  %v982_v7 = vsel %vm975_vm3, %v739_v4, -inf }
 0x2ac   :  { %983 = vmax.xlane.f32.xlu0 %v982_v7  ;;  %v742_v8 = vpop.f32.mrb[14].mxu1 }
 0x2ad   :  { %v3591_v9 = vpop.f32.mrb[15].mxu1 }
 0x2b2   :  { %v785_v10 = vpop.f32.mrb[16].mxu1  ;;  %v923_v12 = vpop.f32.mrb[12].mxu0 }
 0x2b3   :  { %v3596_v13 = vpop.f32.mrb[17].mxu1  ;;  %v3614_v14 = vpop.f32.mrb[13].mxu0  ;;  %v994_v16 = vsel %vm975_vm3, %v923_v12, -inf  ;;  %v985_v17 = vsel %vm975_vm3, %v785_v10, -inf }
 0x2b4   :  { %v926_v18 = vpop.f32.mrb[14].mxu0  ;;  %995 = vmax.xlane.f32.xlu1 %v994_v16  ;;  %986 = vmax.xlane.f32.xlu0 %v985_v17  ;;  %v788_v20 = vpop.f32.mrb[18].mxu1  ;;  %v4503_v17 = vpack.c.bf16 %v4418_v26, %v4418_v26  ;;  %v4525_v26 = vpack.c.bf16 %v4392_v15, %v4392_v15 }
 0x2b5   :  { %v3597_v21 = vpop.f32.mrb[19].mxu1  ;;  %v3615_v22 = vpop.f32.mrb[15].mxu0 }
 0x2b6   :  { %v4517_v21 = vpack.c.bf16 %v4385_v6, %v4385_v6  ;;  %v4531_v22 = vpack.c.bf16 %v4387_v11, %v4387_v11  ;;  %v4543_v6 = vpack.c.bf16 %v4395_v19, %v4395_v19 }
 0x2ba   :  { %v877_v23 = vpop.f32.mrb[20].mxu1 }
 0x2bb   :  { %v3608_v24 = vpop.f32.mrb[21].mxu1  ;;  %v991_v25 = vsel %vm975_vm3, %v877_v23, -inf }
 0x2bc   :  { %992 = vmax.xlane.f32.xlu0 %v991_v25  ;;  %v880_v27 = vpop.f32.mrb[22].mxu1 }
 0x2bd   :  { %v3609_v29 = vpop.f32.mrb[23].mxu1 }
 0x2bf   :  { %v978_v36 = vpop.xlane.xlu0 %977 }
 0x2c0   :  { %v1000_v37 = vsub.f32 %v647_v53, %v978_v36 }
 0x2c2   :  { %v969_v31 = vpop.f32.mrb[24].mxu1  ;;  %v1008_v38 = vmul.f32 1.442695, %v1000_v37 }
 0x2c3   :  { %v3620_v32 = vpop.f32.mrb[25].mxu1  ;;  %v997_v33 = vsel %vm975_vm3, %v969_v31, -inf }
 0x2c4   :  { %998 = vmax.xlane.f32.xlu0 %v997_v33  ;;  %v972_v34 = vpop.f32.mrb[26].mxu1  ;;  %4013 = vpow2.f32 %v1008_v38 }
 0x2c5   :  { %593 = vrot.lane.b32.xlu1 %v4454_v50, %s4229_s4  ;;  %v3621_v35 = vpop.f32.mrb[27].mxu1 }
 0x2ce   :  { %v4469_v39 = vpop.eup %4013 }
 0x2cf   :  { %v1024_v40 = vsel %vm975_vm3, %v4469_v39, 0.0 }
 0x2e9   :  { %1025 = vadd.xlane.f32.xlu1 %v1024_v40 }
 0x331   :  { %v981_v41 = vpop.xlane.xlu1 %980 }
 0x332   :  { %v1001_v42 = vsub.f32 %v693_v62, %v981_v41 }
 0x334   :  { %v1010_v43 = vmul.f32 1.442695, %v1001_v42 }
 0x335   :  { %v990_v44 = vpop.xlane.xlu1 %989 }
 0x336   :  { %4015 = vpow2.f32 %v1010_v43  ;;  %v1004_v45 = vsub.f32 %v831_v54, %v990_v44 }
 0x338   :  { %v1016_v46 = vmul.f32 1.442695, %v1004_v45 }
 0x339   :  { %v984_v47 = vpop.xlane.xlu0 %983 }
 0x33a   :  { %4017 = vpow2.f32 %v1016_v46  ;;  %v1002_v48 = vsub.f32 %v739_v4, %v984_v47 }
 0x33c   :  { %v1012_v49 = vmul.f32 1.442695, %v1002_v48 }
 0x33e   :  { %4019 = vpow2.f32 %v1012_v49 }
 0x340   :  { %v4473_v51 = vpop.eup %4015 }
 0x341   :  { %v996_v53 = vpop.xlane.xlu1 %995  ;;  %v987_v55 = vpop.xlane.xlu0 %986  ;;  %v1027_v56 = vsel %vm975_vm3, %v4473_v51, 0.0 }
 0x342   :  { %v1006_v57 = vsub.f32 %v923_v12, %v996_v53  ;;  %v1003_v58 = vsub.f32 %v785_v10, %v987_v55  ;;  %1028 = vadd.xlane.f32.xlu0 %v1027_v56  ;;  %v1261_v56 = vsel %vm1075_vm2, %v4503_v17, 0 }
 0x344   :  { %v4477_v59 = vpop.eup %4017  ;;  %v1020_v60 = vmul.f32 1.442695, %v1006_v57  ;;  %v1014_v54 = vmul.f32 1.442695, %v1003_v58 }
 0x345   :  { %v594_v61 = vpop.permute.xlu1 %593  ;;  %v1036_v62 = vsel %vm975_vm3, %v4477_v59, 0.0 }
 0x346   :  { %4021 = vpow2.f32 %v1020_v60  ;;  %v1123_v63 = vsel %vm1075_vm2, %v594_v61, 0  ;;  %1037 = vadd.xlane.f32.xlu1 %v1036_v62 }
 0x347   :  { %3629 = vmatpush3.bf16.msra.mxu1 %v1123_v63  ;;  %4023 = vpow2.f32 %v1014_v54 }
 0x348   :  { %v4482_v0 = vpop.eup %4019  ;;  %3640 = vmatprep.subr.bf16.mxu1 %v4227_v52 }
 0x349   :  { %v993_v1 = vpop.xlane.xlu0 %992  ;;  %v1030_v2 = vsel %vm975_vm3, %v4482_v0, 0.0 }
 0x34a   :  { %v1005_v3 = vsub.f32 %v877_v23, %v993_v1  ;;  %1031 = vadd.xlane.f32.xlu1 %v1030_v2 }
 0x34c   :  { %v1018_v4 = vmul.f32 1.442695, %v1005_v3  ;;  %v3981_v3 = vld [vmem:[#allocation10] sm:$0xff]  }
 0x34e   :  { %4025 = vpow2.f32 %v1018_v4 }
 0x350   :  { %v4487_v5 = vpop.eup %4021 }
 0x351   :  { %v999_v7 = vpop.xlane.xlu0 %998  ;;  %v1042_v8 = vsel %vm975_vm3, %v4487_v5, 0.0  ;;  %v4491_v9 = vpop.eup %4023 }
 0x352   :  { %v1007_v10 = vsub.f32 %v969_v31, %v999_v7  ;;  %1043 = vadd.xlane.f32.xlu0 %v1042_v8  ;;  %v1033_v13 = vsel %vm975_vm3, %v4491_v9, 0.0  ;;  %v3982_v7 = vld [vmem:[#allocation10 + $0x8] sm:$0xff]  }
 0x354   :  { %v1022_v12 = vmul.f32 1.442695, %v1007_v10 }
 0x356   :  { %4027 = vpow2.f32 %v1022_v12  ;;  %1034 = vadd.xlane.f32.xlu0 %v1033_v13 }
 0x358   :  { %v4495_v14 = vpop.eup %4025 }
 0x359   :  { %v1039_v16 = vsel %vm975_vm3, %v4495_v14, 0.0 }
 0x35a   :  { %1040 = vadd.xlane.f32.xlu0 %v1039_v16  ;;  %v3989_v16 = vld [vmem:[#allocation10 + $0x28] sm:$0xff]  }
 0x35b   :  { %597 = vrot.lane.b32.xlu1 %v4454_v50, %s4230_s5 }
 0x35f   :  { %600 = vrot.lane.b32.xlu1 %v4503_v17, %s4229_s4 }
 0x360   :  { %v4507_v18 = vpop.eup %4027 }
 0x361   :  { %v1045_v20 = vsel %vm975_vm3, %v4507_v18, 0.0 }
 0x362   :  { %1046 = vadd.xlane.f32.xlu0 %v1045_v20 }
 0x363   :  { %602 = vrot.lane.b32.xlu1 %v4503_v17, %s4224_s2 }
 0x367   :  { %604 = vrot.lane.b32.xlu1 %v4503_v17, %s4230_s5 }
 0x36b   :  { %1957 = vrot.lane.b32.xlu1 %v4517_v21, %s4224_s2 }
 0x36f   :  { %1959 = vrot.lane.b32.xlu1 %v4517_v21, %s4230_s5 }
 0x373   :  { %1943 = vrot.lane.b32.xlu1 %v4525_v26, %s4230_s5 }
 0x376   :  { %v1026_v23 = vpop.xlane.xlu1 %1025 }
 0x377   :  { %4029 = vrcp.f32 %v1026_v23  ;;  %1964 = vrot.lane.b32.xlu1 %v4531_v22, %s4224_s2 }
 0x378   :  { %595 = vrot.lane.b32.xlu0 %v4454_v50, %s4224_s2 }
 0x37b   :  { %1966 = vrot.lane.b32.xlu1 %v4531_v22, %s4230_s5 }
 0x37c   :  { %1955 = vrot.lane.b32.xlu0 %v4517_v21, %s4229_s4 }
 0x37f   :  { %1950 = vrot.lane.b32.xlu1 %v4543_v6, %s4230_s5 }
 0x380   :  { %1939 = vrot.lane.b32.xlu0 %v4525_v26, %s4229_s4 }
 0x381   :  { %v4030_v11 = vpop.eup %4029 }
 0x382   :  { %v1056_v15 = vmul.f32 %v4030_v11, %v4469_v39 }
 0x384   :  { %1941 = vrot.lane.b32.xlu0 %v4525_v26, %s4224_s2  ;;  %v1064_v50 = vpack.c.bf16 %v1056_v15, %v1056_v15 }
 0x386   :  { %3625 = vmatmul.mubr.msk.bf16.vlgmr.msra.gmra.mrb[16].mxu0 %vm975_vm3, %v1064_v50  ;;  %v3986_v50 = vld [vmem:[#allocation10 + $0x38] sm:$0xff]  }
 0x387   :  { %3636 = vmatprep.mubr.msk.bf16.mxu0 %vm4228_vm0, %v4227_v52 }
 0x388   :  { %1962 = vrot.lane.b32.xlu0 %v4531_v22, %s4229_s4 }
 0x38c   :  { %1946 = vrot.lane.b32.xlu0 %v4543_v6, %s4229_s4 }
 0x390   :  { %1948 = vrot.lane.b32.xlu0 %v4543_v6, %s4224_s2 }
 0x3cf   :  { %v1029_v19 = vpop.xlane.xlu0 %1028 }
 0x3d0   :  { %4031 = vrcp.f32 %v1029_v19 }
 0x3d3   :  { %v1038_v24 = vpop.xlane.xlu1 %1037 }
 0x3d7   :  { %v1032_v25 = vpop.xlane.xlu1 %1031 }
 0x3da   :  { %v4032_v27 = vpop.eup %4031 }
 0x3db   :  { %v1057_v29 = vmul.f32 %v4032_v27, %v4473_v51  ;;  %v598_v31 = vpop.permute.xlu1 %597 }
 0x3dc   :  { %v1215_v33 = vsel %vm1075_vm2, %v598_v31, 0 }
 0x3dd   :  { %v1065_v32 = vpack.c.bf16 %v1057_v29, %v1057_v29 }
 0x3df   :  { %3631 = vmatmul.mubr.msk.bf16.vlgmr.msra.gmra.mrb[28].mxu1 %vm975_vm3, %v1065_v32  ;;  %v1044_v34 = vpop.xlane.xlu0 %1043  ;;  %v601_v37 = vpop.permute.xlu1 %600  ;;  %v3990_v32 = vld [vmem:[#allocation10 + $0x58] sm:$0xff]  }
 0x3e0   :  { %3641 = vmatpush3.bf16.msra.mxu1 %v1215_v33  ;;  %3642 = vmatprep.mubr.msk.bf16.mxu1 %vm4228_vm0, %v4227_v52  ;;  %v1307_v46 = vsel %vm1075_vm2, %v601_v37, 0 }
 0x3e1   :  { %3652 = vmatprep.subr.bf16.mxu1 %v4227_v52 }
 0x3e3   :  { %v1035_v35 = vpop.xlane.xlu0 %1034  ;;  %v603_v45 = vpop.permute.xlu1 %602 }
 0x3e4   :  { %4033 = vrcp.f32 %v1035_v35 }
 0x3e5   :  { %4035 = vrcp.f32 %v1032_v25 }
 0x3e7   :  { %v1041_v36 = vpop.xlane.xlu0 %1040  ;;  %v605_v55 = vpop.permute.xlu1 %604 }
 0x3e8   :  { %4037 = vrcp.f32 %v1041_v36  ;;  %v1399_v54 = vsel %vm1075_vm2, %v605_v55, 0 }
 0x3e9   :  { %4039 = vrcp.f32 %v1038_v24  ;;  %v3988_v24 = vld [vmem:[#allocation10 + $0x50] sm:$0xff]  }
 0x3ee   :  { %v4034_v38 = vpop.eup %4033 }
 0x3ef   :  { %v4036_v39 = vpop.eup %4035  ;;  %v1059_v40 = vmul.f32 %v4034_v38, %v4491_v9  ;;  %v1047_v41 = vpop.xlane.xlu0 %1046  ;;  %v3987_v9 = vld [vmem:[#allocation10 + $0x20] sm:$0xff]  }
 0x3f0   :  { %4041 = vrcp.f32 %v1047_v41  ;;  %v1058_v44 = vmul.f32 %v4036_v39, %v4482_v0  ;;  %v1353_v0 = vsel %vm1075_vm2, %v603_v45, 0 }
 0x3f1   :  { %v1067_v42 = vpack.c.bf16 %v1059_v40, %v1059_v40  ;;  %4043 = vrcp.f32 %v1044_v34  ;;  %v3991_v34 = vld [vmem:[#allocation10 + $0x40] sm:$0xff]   ;;  %v3992_v40 = vld [vmem:[#allocation10 + $0x70] sm:$0xff]  }
 0x3f2   :  { %v4038_v43 = vpop.eup %4037  ;;  %v1066_v51 = vpack.c.bf16 %v1058_v44, %v1058_v44 }
 0x3f3   :  { %3643 = vmatmul.mubr.msk.bf16.vlgmr.msra.gmra.mrb[32].mxu1 %vm975_vm3, %v1067_v42  ;;  %v596_v47 = vpop.permute.xlu0 %595  ;;  %v1061_v49 = vmul.f32 %v4038_v43, %v4495_v14  ;;  %v4040_v53 = vpop.eup %4039  ;;  %v3993_v43 = vld [vmem:[#allocation10 + $0x48] sm:$0xff]  }
 0x3f4   :  { %3653 = vmatpush3.bf16.msra.mxu1 %v1307_v46  ;;  %v1169_v48 = vsel %vm1075_vm2, %v596_v47, 0  ;;  %3654 = vmatprep.mubr.msk.bf16.mxu1 %vm4228_vm0, %v4227_v52  ;;  %v1060_v60 = vmul.f32 %v4040_v53, %v4477_v59  ;;  %v3983_v59 = vld [vmem:[#allocation10 + $0x10] sm:$0xff]   ;;  %v3994_v46 = vld [vmem:[#allocation10 + $0x78] sm:$0xff]  }
 0x3f5   :  { %3635 = vmatpush3.bf16.msra.mxu0 %v1169_v48  ;;  %3664 = vmatprep.subr.bf16.mxu1 %v4227_v52  ;;  %v1069_v57 = vpack.c.bf16 %v1061_v49, %v1061_v49  ;;  %v3995_v48 = vld [vmem:[#allocation10 + $0x60] sm:$0xff]  }
 0x3f6   :  { %3646 = vmatprep.subr.bf16.mxu0 %v4227_v52  ;;  %v1068_v62 = vpack.c.bf16 %v1060_v60, %v1060_v60  ;;  %v3996_v60 = vld [vmem:[#allocation10 + $0x68] sm:$0xff]  }
 0x3f8   :  { %3637 = vmatmul.mubr.msk.bf16.vlgmr.msra.gmra.mrb[20].mxu0 %vm975_vm3, %v1066_v51 }
 0x3f9   :  { %3647 = vmatpush3.bf16.msra.mxu0 %v1261_v56  ;;  %3648 = vmatprep.mubr.msk.bf16.mxu0 %vm4228_vm0, %v4227_v52 }
 0x3fa   :  { %v4042_v58 = vpop.eup %4041  ;;  %3658 = vmatprep.subr.bf16.mxu0 %v4227_v52 }
 0x3fb   :  { %3655 = vmatmul.mubr.msk.bf16.vlgmr.msra.gmra.mrb[36].mxu1 %vm975_vm3, %v1069_v57  ;;  %v1063_v61 = vmul.f32 %v4042_v58, %v4507_v18  ;;  %v4044_v63 = vpop.eup %4043  ;;  %v3985_v18 = vld [vmem:[#allocation10 + $0x30] sm:$0xff]  }
 0x3fc   :  { %3665 = vmatpush3.bf16.msra.mxu1 %v1399_v54  ;;  %3666 = vmatprep.mubr.msk.bf16.mxu1 %vm4228_vm0, %v4227_v52  ;;  %v1062_v2 = vmul.f32 %v4044_v63, %v4487_v5  ;;  %v3984_v5 = vld [vmem:[#allocation10 + $0x18] sm:$0xff]   ;;  %v1958_v63 = vpop.permute.xlu1 %1957 }
 0x3fd   :  { %3678 = vmatprep.subr.bf16.mxu1 %v4227_v52  ;;  %v1071_v1 = vpack.c.bf16 %v1063_v61, %v1063_v61  ;;  %v1956_v61 = vpop.permute.xlu0 %1955 }
 0x3fe   :  { %v1070_v4 = vpack.c.bf16 %v1062_v2, %v1062_v2 }
 0x400   :  { %3649 = vmatmul.mubr.msk.bf16.vlgmr.msra.gmra.mrb[24].mxu0 %vm975_vm3, %v1068_v62 }
 0x401   :  { %3659 = vmatpush3.bf16.msra.mxu0 %v1353_v0  ;;  %3660 = vmatprep.mubr.msk.bf16.mxu0 %vm4228_vm0, %v4227_v52 }
 0x402   :  { %3670 = vmatprep.subr.bf16.mxu0 %v4227_v52 }
 0x403   :  { %3667 = vmatmul.mubr.msk.bf16.vlgmr.msra.gmra.mrb[40].mxu1 %vm975_vm3, %v1071_v1 }
 0x404   :  { %3679 = vmatpush3.bf16.msra.mxu1 %v3983_v59  ;;  %3682 = vmatprep.mubr.msk.bf16.mxu1 %vm4228_vm0, %v4227_v52 }
 0x405   :  { %3680 = vmatprep.subr.bf16.mxu1 %v4227_v52 }
 0x408   :  { %3661 = vmatmul.mubr.msk.bf16.vlgmr.msra.gmra.mrb[28].mxu0 %vm975_vm3, %v1070_v4  ;;  %3681 = vmatpush3.bf16.msra.mxu1 %v3984_v5  ;;  %v1960_v5 = vpop.permute.xlu1 %1959 }
 0x409   :  { %3671 = vmatpush3.bf16.msra.mxu0 %v3981_v3  ;;  %3674 = vmatprep.mubr.msk.bf16.mxu0 %vm4228_vm0, %v4227_v52  ;;  %v2034_v3 = vsel %vm606_vm1, %v1956_v61, 0 }
 0x40a   :  { %3672 = vmatprep.subr.bf16.mxu0 %v4227_v52  ;;  %3694 = vmatprep.subr.bf16.mxu1 %v4227_v52 }
 0x40d   :  { %3673 = vmatpush3.bf16.msra.mxu0 %v3982_v7  ;;  %v1940_v7 = vpop.permute.xlu0 %1939 }
 0x40e   :  { %3686 = vmatprep.subr.bf16.mxu0 %v4227_v52 }
 0x459   :  { %v1113_v8 = vpop.f32.mrb[16].mxu0 }
 0x45a   :  { %v1441_v10 = vpack.c.bf16 %v1113_v8, %v1113_v8  ;;  %v3626_v12 = vpop.f32.mrb[17].mxu0  ;;  %v1988_v8 = vsel %vm606_vm1, %v4517_v21, 0 }
 0x45b   :  { %v1116_v13 = vpop.f32.mrb[18].mxu0  ;;  %v1944_v12 = vpop.permute.xlu1 %1943 }
 0x45c   :  { %v3627_v14 = vpop.f32.mrb[19].mxu0  ;;  %3675 = vmatmul.mubr.msk.bf16.vlgmr.msra.gmra.mrb[32].mxu0 %vm606_vm1, %v1441_v10  ;;  %v2126_v10 = vsel %vm606_vm1, %v1960_v5, 0  ;;  %v2080_v13 = vsel %vm606_vm1, %v1958_v63, 0  ;;  %v4696_v63 = vld [vmem:[%s4856_s8] ss:$0 sm:$0xff]  ;;  %s4231_s8 = smov [#allocation11]  }
 0x45d   :  { %3687 = vmatpush3.bf16.msra.mxu0 %v3987_v9  ;;  %3690 = vmatprep.mubr.msk.bf16.mxu0 %vm4228_vm0, %v4227_v52  ;;  %v1942_v9 = vpop.permute.xlu0 %1941  ;;  %s3318_s14 = sshll.u32 %s4231_s8, 4  ;;  %s3319_s14 = int_to_ptr.vmem [resolvable:$true] %s3318_s14 }
 0x45e   :  { %3688 = vmatprep.subr.bf16.mxu0 %v4227_v52  ;;  %s4187_s0 = scalar_lea.vmem %s3319_s14, 256  ;;  %p4192_p13 = scmp.lt.s32.totalorder %s3319_s14, %s3319_s14 }
 0x45f   :  { %v1965_v21 = vpop.permute.xlu1 %1964  ;;  %p4188_p12 = scmp.ne.s32.totalorder %s3319_s14, %s4187_s0  ;;  %p4193_p0 = scmp.lt.s32.totalorder %s4187_s0, %s4187_s0 }
 0x461   :  { %3689 = vmatpush3.bf16.msra.mxu0 %v3989_v16  ;;  %v1963_v14 = vpop.permute.xlu0 %1962  ;;  %p4194_p1 = por %p4193_p0, %p4192_p13 }
 0x462   :  { %3702 = vmatprep.subr.bf16.mxu0 %v4227_v52  ;;  %v2218_v16 = vsel %vm606_vm1, %v1963_v14, 0 }
 0x463   :  { %p4195_p2 = pnand %p4194_p1, %p4188_p12 }
 0x4b2   :  { %v1159_v17 = vpop.f32.mrb[28].mxu1 }
 0x4b3   :  { %v1442_v20 = vpack.c.bf16 %v1159_v17, %v1159_v17  ;;  %v3632_v23 = vpop.f32.mrb[29].mxu1  ;;  %v1967_v17 = vpop.permute.xlu1 %1966 }
 0x4b4   :  { %v1162_v11 = vpop.f32.mrb[30].mxu1  ;;  %v2264_v23 = vsel %vm606_vm1, %v1965_v21, 0 }
 0x4b5   :  { %v3633_v15 = vpop.f32.mrb[31].mxu1  ;;  %3683 = vmatmul.mubr.msk.bf16.vlgmr.msra.gmra.mrb[44].mxu1 %vm606_vm1, %v1442_v20  ;;  %v2310_v20 = vsel %vm606_vm1, %v1967_v17, 0  ;;  %v4683_v11 = vpack.c.bf16 %v4420_v28, %v4420_v28 }
 0x4b6   :  { %3695 = vmatpush3.bf16.msra.mxu1 %v3985_v18  ;;  %3698 = vmatprep.mubr.msk.bf16.mxu1 %vm4228_vm0, %v4227_v52  ;;  %v1947_v18 = vpop.permute.xlu0 %1946 }
 0x4b7   :  { %3696 = vmatprep.subr.bf16.mxu1 %v4227_v52 }
 0x4ba   :  { %3697 = vmatpush3.bf16.msra.mxu1 %v3986_v50  ;;  %v1949_v15 = vpop.permute.xlu0 %1948 }
 0x4bb   :  { %3710 = vmatprep.subr.bf16.mxu1 %v4227_v52 }
 0x4c6   :  { %v1251_v19 = vpop.f32.mrb[32].mxu1 }
 0x4c7   :  { %v1444_v25 = vpack.c.bf16 %v1251_v19, %v1251_v19  ;;  %v3644_v27 = vpop.f32.mrb[33].mxu1 }
 0x4c8   :  { %v1254_v29 = vpop.f32.mrb[34].mxu1 }
 0x4c9   :  { %v3645_v31 = vpop.f32.mrb[35].mxu1  ;;  %3699 = vmatmul.mubr.msk.bf16.vlgmr.msra.gmra.mrb[48].mxu1 %vm606_vm1, %v1444_v25 }
 0x4ca   :  { %3711 = vmatpush3.bf16.msra.mxu1 %v3988_v24  ;;  %3714 = vmatprep.mubr.msk.bf16.mxu1 %vm4228_vm0, %v4227_v52 }
 0x4cb   :  { %v1205_v33 = vpop.f32.mrb[20].mxu0  ;;  %3712 = vmatprep.subr.bf16.mxu1 %v4227_v52 }
 0x4cc   :  { %v1443_v35 = vpack.c.bf16 %v1205_v33, %v1205_v33  ;;  %v3638_v36 = vpop.f32.mrb[21].mxu0 }
 0x4cd   :  { %v1208_v37 = vpop.f32.mrb[22].mxu0 }
 0x4ce   :  { %3713 = vmatpush3.bf16.msra.mxu1 %v3990_v32  ;;  %v3639_v38 = vpop.f32.mrb[23].mxu0  ;;  %v1343_v39 = vpop.f32.mrb[36].mxu1  ;;  %3691 = vmatmul.mubr.msk.bf16.vlgmr.msra.gmra.mrb[36].mxu0 %vm606_vm1, %v1443_v35 }
 0x4cf   :  { %v1446_v41 = vpack.c.bf16 %v1343_v39, %v1343_v39  ;;  %3703 = vmatpush3.bf16.msra.mxu0 %v3991_v34  ;;  %v3656_v42 = vpop.f32.mrb[37].mxu1  ;;  %3726 = vmatprep.subr.bf16.mxu1 %v4227_v52 }
 0x4d0   :  { %v1346_v44 = vpop.f32.mrb[38].mxu1  ;;  %3704 = vmatprep.subr.bf16.mxu0 %v4227_v52  ;;  %3706 = vmatprep.mubr.msk.bf16.mxu0 %vm4228_vm0, %v4227_v52 }
 0x4d1   :  { %v3657_v45 = vpop.f32.mrb[39].mxu1  ;;  %3715 = vmatmul.mubr.msk.bf16.vlgmr.msra.gmra.mrb[52].mxu1 %vm606_vm1, %v1446_v41 }
 0x4d2   :  { %3727 = vmatpush3.bf16.msra.mxu1 %v3992_v40  ;;  %3730 = vmatprep.mubr.msk.bf16.mxu1 %vm4228_vm0, %v4227_v52 }
 0x4d3   :  { %3705 = vmatpush3.bf16.msra.mxu0 %v3993_v43  ;;  %v1297_v47 = vpop.f32.mrb[24].mxu0  ;;  %3728 = vmatprep.subr.bf16.mxu1 %v4227_v52 }
 0x4d4   :  { %v1445_v49 = vpack.c.bf16 %v1297_v47, %v1297_v47  ;;  %v3650_v51 = vpop.f32.mrb[25].mxu0  ;;  %3718 = vmatprep.subr.bf16.mxu0 %v4227_v52 }
 0x4d5   :  { %v1300_v53 = vpop.f32.mrb[26].mxu0 }
 0x4d6   :  { %3729 = vmatpush3.bf16.msra.mxu1 %v3994_v46  ;;  %v3651_v55 = vpop.f32.mrb[27].mxu0  ;;  %v1435_v56 = vpop.f32.mrb[40].mxu1  ;;  %3707 = vmatmul.mubr.msk.bf16.vlgmr.msra.gmra.mrb[40].mxu0 %vm606_vm1, %v1445_v49 }
 0x4d7   :  { %v1448_v57 = vpack.c.bf16 %v1435_v56, %v1435_v56  ;;  %3719 = vmatpush3.bf16.msra.mxu0 %v3995_v48  ;;  %v3668_v58 = vpop.f32.mrb[41].mxu1  ;;  %3722 = vmatprep.mubr.msk.bf16.mxu0 %vm4228_vm0, %v4227_v52 }
 0x4d8   :  { %v1438_v54 = vpop.f32.mrb[42].mxu1  ;;  %3720 = vmatprep.subr.bf16.mxu0 %v4227_v52  ;;  %3740 = vmatprep.subr.bf16.mxu1 %v4227_v52 }
 0x4d9   :  { %v3669_v62 = vpop.f32.mrb[43].mxu1  ;;  %3731 = vmatmul.mubr.msk.bf16.vlgmr.msra.gmra.mrb[56].mxu1 %vm606_vm1, %v1448_v57 }
 0x4da   :  { %3742 = vmatprep.mubr.msk.bf16.mxu1 %vm4228_vm0, %v4227_v52 }
 0x4db   :  { %3721 = vmatpush3.bf16.msra.mxu0 %v3996_v60  ;;  %v1389_v0 = vpop.f32.mrb[28].mxu0 }
 0x4dc   :  { %v1447_v59 = vpack.c.bf16 %v1389_v0, %v1389_v0  ;;  %v3662_v1 = vpop.f32.mrb[29].mxu0  ;;  %3734 = vmatprep.subr.bf16.mxu0 %v4227_v52 }
 0x4dd   :  { %v1392_v2 = vpop.f32.mrb[30].mxu0 }
 0x4de   :  { %v3663_v4 = vpop.f32.mrb[31].mxu0  ;;  %3723 = vmatmul.mubr.msk.bf16.vlgmr.msra.gmra.mrb[44].mxu0 %vm606_vm1, %v1447_v59 }
 0x4df   :  { %3741 = vmatpush3.bf16.xpose.msra.mxu1 %v2034_v3  ;;  %3736 = vmatprep.mubr.msk.bf16.mxu0 %vm4228_vm0, %v4227_v52 }
 0x4e0   :  { %3752 = vmatprep.subr.bf16.mxu1 %v4227_v52 }
 0x4e4   :  { %3735 = vmatpush3.bf16.xpose.msra.mxu0 %v1988_v8 }
 0x4e5   :  { %3746 = vmatprep.subr.bf16.mxu0 %v4227_v52 }
 0x4e6   :  { %3743 = vmatmul.mubr.msk.bf16.vlgmr.msra.gmra.mrb[60].mxu1 %vm606_vm1, %v1940_v7 }
 0x4e7   :  { %3753 = vmatpush3.bf16.xpose.msra.mxu1 %v2126_v10  ;;  %3754 = vmatprep.mubr.msk.bf16.mxu1 %vm4228_vm0, %v4227_v52 }
 0x4e8   :  { %3764 = vmatprep.subr.bf16.mxu1 %v4227_v52 }
 0x4eb   :  { %3737 = vmatmul.mubr.msk.bf16.vlgmr.msra.gmra.mrb[48].mxu0 %vm606_vm1, %v4525_v26  ;;  %v2172_v26 = vsel %vm606_vm1, %v4531_v22, 0  ;;  %v1951_v22 = vpop.permute.xlu1 %1950 }
 0x4ec   :  { %3747 = vmatpush3.bf16.xpose.msra.mxu0 %v2080_v13  ;;  %3748 = vmatprep.mubr.msk.bf16.mxu0 %vm4228_vm0, %v4227_v52 }
 0x4ed   :  { %3758 = vmatprep.subr.bf16.mxu0 %v4227_v52 }
 0x4ee   :  { %3755 = vmatmul.mubr.msk.bf16.vlgmr.msra.gmra.mrb[64].mxu1 %vm606_vm1, %v1944_v12 }
 0x4ef   :  { %3765 = vmatpush3.bf16.xpose.msra.mxu1 %v2218_v16  ;;  %3766 = vmatprep.mubr.msk.bf16.mxu1 %vm4228_vm0, %v4227_v52 }
 0x4f0   :  { %3776 = vmatprep.subr.bf16.mxu1 %v4227_v52 }
 0x4f3   :  { %3749 = vmatmul.mubr.msk.bf16.vlgmr.msra.gmra.mrb[52].mxu0 %vm606_vm1, %v1942_v9 }
 0x4f4   :  { %3759 = vmatpush3.bf16.xpose.msra.mxu0 %v2172_v26  ;;  %3760 = vmatprep.mubr.msk.bf16.mxu0 %vm4228_vm0, %v4227_v52 }
 0x4f5   :  { %3770 = vmatprep.subr.bf16.mxu0 %v4227_v52 }
 0x4f6   :  { %3767 = vmatmul.mubr.msk.bf16.vlgmr.msra.gmra.mrb[68].mxu1 %vm606_vm1, %v1947_v18 }
 0x4f7   :  { %3777 = vmatpush3.bf16.xpose.msra.mxu1 %v2310_v20  ;;  %3778 = vmatprep.mubr.msk.bf16.mxu1 %vm4228_vm0, %v4227_v52 }
 0x4f8   :  { %3788 = vmatprep.subr.bf16.mxu1 %v4227_v52 }
 0x4fb   :  { %3761 = vmatmul.mubr.msk.bf16.vlgmr.msra.gmra.mrb[56].mxu0 %vm606_vm1, %v4543_v6  ;;  %v2452_v6 = vsel %vm1075_vm2, %v4683_v11, 0 }
 0x4fc   :  { %3771 = vmatpush3.bf16.xpose.msra.mxu0 %v2264_v23  ;;  %3772 = vmatprep.mubr.msk.bf16.mxu0 %vm4228_vm0, %v4227_v52 }
 0x4fd   :  { %3782 = vmatprep.subr.bf16.mxu0 %v4227_v52 }
 0x4fe   :  { %3779 = vmatmul.mubr.msk.bf16.vlgmr.msra.gmra.mrb[72].mxu1 %vm606_vm1, %v1951_v22 }
 0x4ff   :  { %3790 = vmatprep.mubr.msk.bf16.mxu1 %vm4228_vm0, %v4227_v52 }
 0x503   :  { %3773 = vmatmul.mubr.msk.bf16.vlgmr.msra.gmra.mrb[60].mxu0 %vm606_vm1, %v1949_v15 }
 0x504   :  { %3783 = vmatpush3.bf16.msra.mxu0 %v2452_v6  ;;  %3784 = vmatprep.mubr.msk.bf16.mxu0 %vm4228_vm0, %v4227_v52 }
 0x505   :  { %3794 = vmatprep.subr.bf16.mxu0 %v4227_v52 }
 0x52f   :  { %v1530_v50 = vpop.f32.mrb[32].mxu0 }
 0x530   :  { %v3676_v19 = vpop.f32.mrb[33].mxu0 }
 0x531   :  { %v1533_v24 = vpop.f32.mrb[34].mxu0 }
 0x532   :  { %v3677_v28 = vpop.f32.mrb[35].mxu0 }
 0x588   :  { %v1585_v25 = vpop.f32.mrb[44].mxu1 }
 0x589   :  { %v1921_v27 = vadd.f32 %v1585_v25, %v1530_v50  ;;  %v3684_v29 = vpop.f32.mrb[45].mxu1 }
 0x58a   :  { %v1588_v31 = vpop.f32.mrb[46].mxu1 }
 0x58b   :  { %v3685_v32 = vpop.f32.mrb[47].mxu1 }
 0x59c   :  { %v1695_v33 = vpop.f32.mrb[48].mxu1 }
 0x59d   :  { %v3700_v34 = vpop.f32.mrb[49].mxu1 }
 0x59e   :  { %v1698_v35 = vpop.f32.mrb[50].mxu1 }
 0x59f   :  { %v3701_v36 = vpop.f32.mrb[51].mxu1 }
 0x5a1   :  { %v1640_v37 = vpop.f32.mrb[36].mxu0 }
 0x5a2   :  { %v1922_v38 = vadd.f32 %v1921_v27, %v1640_v37  ;;  %v3692_v39 = vpop.f32.mrb[37].mxu0 }
 0x5a3   :  { %v1643_v40 = vpop.f32.mrb[38].mxu0 }
 0x5a4   :  { %v3693_v41 = vpop.f32.mrb[39].mxu0  ;;  %v1805_v42 = vpop.f32.mrb[52].mxu1  ;;  %v1923_v43 = vadd.f32 %v1922_v38, %v1695_v33 }
 0x5a5   :  { %v3716_v44 = vpop.f32.mrb[53].mxu1 }
 0x5a6   :  { %v1808_v45 = vpop.f32.mrb[54].mxu1 }
 0x5a7   :  { %v3717_v46 = vpop.f32.mrb[55].mxu1 }
 0x5a9   :  { %v1750_v47 = vpop.f32.mrb[40].mxu0 }
 0x5aa   :  { %v1924_v48 = vadd.f32 %v1923_v43, %v1750_v47  ;;  %v3708_v49 = vpop.f32.mrb[41].mxu0 }
 0x5ab   :  { %v1753_v51 = vpop.f32.mrb[42].mxu0 }
 0x5ac   :  { %v3709_v53 = vpop.f32.mrb[43].mxu0  ;;  %v1915_v55 = vpop.f32.mrb[56].mxu1  ;;  %v1925_v56 = vadd.f32 %v1924_v48, %v1805_v42 }
 0x5ad   :  { %v3732_v57 = vpop.f32.mrb[57].mxu1 }
 0x5ae   :  { %v1918_v58 = vpop.f32.mrb[58].mxu1 }
 0x5af   :  { %v3733_v60 = vpop.f32.mrb[59].mxu1 }
 0x5b1   :  { %v1860_v54 = vpop.f32.mrb[44].mxu0 }
 0x5b2   :  { %v1926_v61 = vadd.f32 %v1925_v56, %v1860_v54  ;;  %v3724_v62 = vpop.f32.mrb[45].mxu0 }
 0x5b3   :  { %v1863_v0 = vpop.f32.mrb[46].mxu0  ;;  %v4731_v62 = vpack.c.bf16 %v4422_v30, %v4422_v30 }
 0x5b4   :  { %v1927_v59 = vadd.f32 %v1926_v61, %v1915_v55  ;;  %v3725_v1 = vpop.f32.mrb[47].mxu0 }
 0x5b6   :  { %v1935_v2 = vadd.f32 %v4696_v63, %v1927_v59 }
 0x5b8   :  { %3311 = vst [vmem:[#allocation11] sm:$0xff] %v1935_v2 }
 0x5b9   :  { %v2070_v3 = vpop.f32.mrb[60].mxu1 }
 0x5ba   :  { %v3744_v4 = vpop.f32.mrb[61].mxu1  ;;  %v2355_v7 = vsel %vm975_vm3, %v2070_v3, -inf }
 0x5bb   :  { %2356 = vmax.xlane.f32.xlu1 %v2355_v7  ;;  %v2073_v5 = vpop.f32.mrb[62].mxu1 }
 0x5bc   :  { %v3745_v8 = vpop.f32.mrb[63].mxu1 }
 0x5be   :  { %v2024_v9 = vpop.f32.mrb[48].mxu0 }
 0x5bf   :  { %v3738_v10 = vpop.f32.mrb[49].mxu0  ;;  %v2352_v12 = vsel %vm975_vm3, %v2024_v9, -inf }
 0x5c0   :  { %2353 = vmax.xlane.f32.xlu0 %v2352_v12  ;;  %v2027_v13 = vpop.f32.mrb[50].mxu0 }
 0x5c1   :  { %v3739_v14 = vpop.f32.mrb[51].mxu0  ;;  %v4701_v21 = vpop.f32.mrb[64].mxu1 }
 0x5c2   :  { %v3756_v16 = vpop.f32.mrb[65].mxu1  ;;  %v2361_v24 = vsel %vm975_vm3, %v4701_v21, -inf }
 0x5c3   :  { %v2165_v17 = vpop.f32.mrb[66].mxu1 }
 0x5c4   :  { %v3757_v26 = vpop.f32.mrb[67].mxu1 }
 0x5c6   :  { %v4703_v18 = vpop.f32.mrb[52].mxu0 }
 0x5c7   :  { %v3750_v20 = vpop.f32.mrb[53].mxu0  ;;  %v2358_v23 = vsel %vm975_vm3, %v4703_v18, -inf }
 0x5c8   :  { %2359 = vmax.xlane.f32.xlu0 %v2358_v23  ;;  %v2119_v22 = vpop.f32.mrb[54].mxu0 }
 0x5c9   :  { %v3751_v15 = vpop.f32.mrb[55].mxu0  ;;  %v2254_v6 = vpop.f32.mrb[68].mxu1 }
 0x5ca   :  { %v3768_v50 = vpop.f32.mrb[69].mxu1  ;;  %v2367_v31 = vsel %vm975_vm3, %v2254_v6, -inf }
 0x5cb   :  { %v2257_v19 = vpop.f32.mrb[70].mxu1 }
 0x5cc   :  { %2362 = vmax.xlane.f32.xlu0 %v2361_v24  ;;  %v3769_v28 = vpop.f32.mrb[71].mxu1 }
 0x5ce   :  { %v2208_v25 = vpop.f32.mrb[56].mxu0 }
 0x5cf   :  { %v3762_v27 = vpop.f32.mrb[57].mxu0  ;;  %v2364_v29 = vsel %vm975_vm3, %v2208_v25, -inf }
 0x5d0   :  { %v2211_v32 = vpop.f32.mrb[58].mxu0  ;;  %2365 = vmax.xlane.f32.xlu1 %v2364_v29  ;;  %2368 = vmax.xlane.f32.xlu0 %v2367_v31 }
 0x5d1   :  { %v3763_v33 = vpop.f32.mrb[59].mxu0  ;;  %v2346_v34 = vpop.f32.mrb[72].mxu1 }
 0x5d2   :  { %v3780_v35 = vpop.f32.mrb[73].mxu1  ;;  %v2373_v36 = vsel %vm975_vm3, %v2346_v34, -inf }
 0x5d3   :  { %v2349_v37 = vpop.f32.mrb[74].mxu1 }
 0x5d4   :  { %2374 = vmax.xlane.f32.xlu0 %v2373_v36  ;;  %v3781_v38 = vpop.f32.mrb[75].mxu1 }
 0x5d6   :  { %v2300_v39 = vpop.f32.mrb[60].mxu0 }
 0x5d7   :  { %v3774_v40 = vpop.f32.mrb[61].mxu0  ;;  %v2370_v41 = vsel %vm975_vm3, %v2300_v39, -inf }
 0x5d8   :  { %v2303_v42 = vpop.f32.mrb[62].mxu0  ;;  %2371 = vmax.xlane.f32.xlu1 %v2370_v41 }
 0x5d9   :  { %v3775_v43 = vpop.f32.mrb[63].mxu0 }
 0x5e9   :  { %1971 = vrot.lane.b32.xlu1 %v4683_v11, %s4229_s4 }
 0x648   :  { %v2357_v44 = vpop.xlane.xlu1 %2356 }
 0x649   :  { %v2377_v45 = vsub.f32 %v2070_v3, %v2357_v44 }
 0x64b   :  { %v2386_v46 = vmul.f32 1.442695, %v2377_v45 }
 0x64d   :  { %4045 = vpow2.f32 %v2386_v46  ;;  %v2354_v47 = vpop.xlane.xlu0 %2353 }
 0x64e   :  { %v2376_v48 = vsub.f32 %v2024_v9, %v2354_v47 }
 0x650   :  { %v2384_v49 = vmul.f32 1.442695, %v2376_v48 }
 0x652   :  { %4047 = vpow2.f32 %v2384_v49 }
 0x655   :  { %v2360_v61 = vpop.xlane.xlu0 %2359 }
 0x656   :  { %v2378_v8 = vsub.f32 %v4703_v18, %v2360_v61  ;;  %v2636_v61 = vsel %vm1075_vm2, %v4731_v62, 0 }
 0x657   :  { %v4715_v51 = vpop.eup %4045 }
 0x658   :  { %v2403_v53 = vsel %vm975_vm3, %v4715_v51, 0.0  ;;  %v2388_v9 = vmul.f32 1.442695, %v2378_v8 }
 0x659   :  { %2404 = vadd.xlane.f32.xlu0 %v2403_v53  ;;  %v2363_v0 = vpop.xlane.xlu0 %2362 }
 0x65a   :  { %v2379_v1 = vsub.f32 %v4701_v21, %v2363_v0 }
 0x65c   :  { %v4719_v55 = vpop.eup %4047  ;;  %v2390_v2 = vmul.f32 1.442695, %v2379_v1  ;;  %v3997_v1 = vld [vmem:[#allocation10 + $0x10] sm:$0xff]  }
 0x65d   :  { %v2400_v56 = vsel %vm975_vm3, %v4719_v55, 0.0  ;;  %v2366_v57 = vpop.xlane.xlu1 %2365  ;;  %v2369_v59 = vpop.xlane.xlu0 %2368 }
 0x65e   :  { %2401 = vadd.xlane.f32.xlu1 %v2400_v56  ;;  %v2381_v3 = vsub.f32 %v2254_v6, %v2369_v59  ;;  %4049 = vpow2.f32 %v2390_v2  ;;  %v2380_v30 = vsub.f32 %v2208_v25, %v2366_v57 }
 0x660   :  { %v2394_v7 = vmul.f32 1.442695, %v2381_v3  ;;  %v2392_v10 = vmul.f32 1.442695, %v2380_v30  ;;  %v4000_v30 = vld [vmem:[#allocation10 + $0x8] sm:$0xff]  }
 0x661   :  { %v2375_v4 = vpop.xlane.xlu0 %2374 }
 0x662   :  { %v2383_v5 = vsub.f32 %v2346_v34, %v2375_v4  ;;  %4051 = vpow2.f32 %v2394_v7 }
 0x665   :  { %v2372_v58 = vpop.xlane.xlu1 %2371 }
 0x666   :  { %v2382_v12 = vsub.f32 %v2300_v39, %v2372_v58 }
 0x668   :  { %v4050_v13 = vpop.eup %4049  ;;  %v2396_v14 = vmul.f32 1.442695, %v2382_v12  ;;  %v4001_v12 = vld [vmem:[#allocation10 + $0x30] sm:$0xff]  }
 0x669   :  { %v1972_v60 = vpop.permute.xlu1 %1971  ;;  %v2409_v21 = vsel %vm975_vm3, %v4050_v13, 0.0 }
 0x66a   :  { %v2498_v54 = vsel %vm1075_vm2, %v1972_v60, 0 }
 0x66b   :  { %3789 = vmatpush3.bf16.msra.mxu1 %v2498_v54 }
 0x66c   :  { %3800 = vmatprep.subr.bf16.mxu1 %v4227_v52  ;;  %v4052_v16 = vpop.eup %4051 }
 0x66d   :  { %v2415_v17 = vsel %vm975_vm3, %v4052_v16, 0.0 }
 0x66f   :  { %1975 = vrot.lane.b32.xlu1 %v4683_v11, %s4230_s5  ;;  %1973 = vrot.lane.b32.xlu0 %v4683_v11, %s4224_s2  ;;  %v2398_v11 = vmul.f32 1.442695, %v2383_v5 }
 0x671   :  { %4053 = vpow2.f32 %v2398_v11  ;;  %v3998_v11 = vld [vmem:[#allocation10 + $0x18] sm:$0xff]  }
 0x672   :  { %4055 = vpow2.f32 %v2388_v9  ;;  %v3999_v9 = vld [vmem:[#allocation10] sm:$0xff]  }
 0x673   :  { %1978 = vrot.lane.b32.xlu1 %v4731_v62, %s4229_s4  ;;  %4057 = vpow2.f32 %v2392_v10 }
 0x674   :  { %4059 = vpow2.f32 %v2396_v14 }
 0x67b   :  { %v4739_v26 = vpop.eup %4053 }
 0x67c   :  { %v4056_v18 = vpop.eup %4055  ;;  %v2421_v20 = vsel %vm975_vm3, %v4739_v26, 0.0 }
 0x67d   :  { %v2406_v23 = vsel %vm975_vm3, %v4056_v18, 0.0  ;;  %v4744_v22 = vpop.eup %4057 }
 0x67e   :  { %v2412_v15 = vsel %vm975_vm3, %v4744_v22, 0.0  ;;  %v4748_v6 = vpop.eup %4059 }
 0x67f   :  { %v2418_v50 = vsel %vm975_vm3, %v4748_v6, 0.0 }
 0x68e   :  { %2410 = vadd.xlane.f32.xlu0 %v2409_v21 }
 0x692   :  { %2416 = vadd.xlane.f32.xlu0 %v2415_v17  ;;  %v4002_v17 = vld [vmem:[#allocation10 + $0x38] sm:$0xff]  }
 0x696   :  { %2422 = vadd.xlane.f32.xlu0 %v2421_v20 }
 0x697   :  { %2407 = vadd.xlane.f32.xlu1 %v2406_v23 }
 0x69b   :  { %2413 = vadd.xlane.f32.xlu1 %v2412_v15 }
 0x69f   :  { %2419 = vadd.xlane.f32.xlu1 %v2418_v50 }
 0x6ac   :  { %1980 = vrot.lane.b32.xlu0 %v4731_v62, %s4224_s2 }
 0x6b0   :  { %1982 = vrot.lane.b32.xlu1 %v4731_v62, %s4230_s5 }
 0x6e6   :  { %v2405_v19 = vpop.xlane.xlu0 %2404 }
 0x6e7   :  { %4061 = vrcp.f32 %v2405_v19  ;;  %v4003_v19 = vld [vmem:[#allocation10 + $0x50] sm:$0xff]  }
 0x6ea   :  { %v1974_v34 = vpop.permute.xlu0 %1973 }
 0x6eb   :  { %v2402_v24 = vpop.xlane.xlu1 %2401  ;;  %v2544_v36 = vsel %vm1075_vm2, %v1974_v34, 0 }
 0x6ec   :  { %4063 = vrcp.f32 %v2402_v24 }
 0x6ef   :  { %v1976_v27 = vpop.permute.xlu1 %1975 }
 0x6f0   :  { %v2590_v32 = vsel %vm1075_vm2, %v1976_v27, 0 }
 0x6f1   :  { %v4062_v28 = vpop.eup %4061 }
 0x6f2   :  { %v2433_v25 = vmul.f32 %v4062_v28, %v4715_v51 }
 0x6f3   :  { %v1979_v39 = vpop.permute.xlu1 %1978 }
 0x6f4   :  { %v2441_v29 = vpack.c.bf16 %v2433_v25, %v2433_v25  ;;  %v2682_v47 = vsel %vm1075_vm2, %v1979_v39, 0 }
 0x6f6   :  { %v4064_v31 = vpop.eup %4063  ;;  %3791 = vmatmul.mubr.msk.bf16.vlgmr.msra.gmra.mrb[76].mxu1 %vm975_vm3, %v2441_v29  ;;  %v4005_v29 = vld [vmem:[#allocation10 + $0x58] sm:$0xff]  }
 0x6f7   :  { %v2432_v33 = vmul.f32 %v4064_v31, %v4719_v55  ;;  %3801 = vmatpush3.bf16.msra.mxu1 %v2590_v32  ;;  %3802 = vmatprep.mubr.msk.bf16.mxu1 %vm4228_vm0, %v4227_v52  ;;  %v4007_v32 = vld [vmem:[#allocation10 + $0x70] sm:$0xff]  }
 0x6f8   :  { %3812 = vmatprep.subr.bf16.mxu1 %v4227_v52 }
 0x6f9   :  { %v2440_v35 = vpack.c.bf16 %v2432_v33, %v2432_v33 }
 0x6fb   :  { %3785 = vmatmul.mubr.msk.bf16.vlgmr.msra.gmra.mrb[64].mxu0 %vm975_vm3, %v2440_v35 }
 0x6fc   :  { %3795 = vmatpush3.bf16.msra.mxu0 %v2544_v36  ;;  %3796 = vmatprep.mubr.msk.bf16.mxu0 %vm4228_vm0, %v4227_v52  ;;  %v4008_v36 = vld [vmem:[#allocation10 + $0x40] sm:$0xff]  }
 0x6fd   :  { %3806 = vmatprep.subr.bf16.mxu0 %v4227_v52 }
 0x71b   :  { %v2411_v37 = vpop.xlane.xlu0 %2410 }
 0x71c   :  { %4065 = vrcp.f32 %v2411_v37 }
 0x71f   :  { %v2417_v38 = vpop.xlane.xlu0 %2416 }
 0x720   :  { %4067 = vrcp.f32 %v2417_v38 }
 0x723   :  { %v2423_v41 = vpop.xlane.xlu0 %2422 }
 0x724   :  { %v2408_v40 = vpop.xlane.xlu1 %2407 }
 0x725   :  { %4069 = vrcp.f32 %v2408_v40 }
 0x726   :  { %v4066_v42 = vpop.eup %4065  ;;  %4071 = vrcp.f32 %v2423_v41 }
 0x727   :  { %v2435_v43 = vmul.f32 %v4066_v42, %v4050_v13  ;;  %v1981_v2 = vpop.permute.xlu0 %1980 }
 0x728   :  { %v2414_v44 = vpop.xlane.xlu1 %2413  ;;  %v2728_v7 = vsel %vm1075_vm2, %v1981_v2, 0 }
 0x729   :  { %4073 = vrcp.f32 %v2414_v44  ;;  %v2443_v45 = vpack.c.bf16 %v2435_v43, %v2435_v43  ;;  %v4009_v43 = vld [vmem:[#allocation10 + $0x78] sm:$0xff]   ;;  %v4010_v44 = vld [vmem:[#allocation10 + $0x48] sm:$0xff]  }
 0x72a   :  { %v4068_v46 = vpop.eup %4067 }
 0x72b   :  { %3803 = vmatmul.mubr.msk.bf16.vlgmr.msra.gmra.mrb[80].mxu1 %vm975_vm3, %v2443_v45  ;;  %v2437_v49 = vmul.f32 %v4068_v46, %v4052_v16 }
 0x72c   :  { %3813 = vmatpush3.bf16.msra.mxu1 %v2682_v47  ;;  %v2420_v48 = vpop.xlane.xlu1 %2419  ;;  %3814 = vmatprep.mubr.msk.bf16.mxu1 %vm4228_vm0, %v4227_v52 }
 0x72d   :  { %3824 = vmatprep.subr.bf16.mxu1 %v4227_v52  ;;  %4075 = vrcp.f32 %v2420_v48  ;;  %v2445_v57 = vpack.c.bf16 %v2437_v49, %v2437_v49  ;;  %v4011_v49 = vld [vmem:[#allocation10 + $0x60] sm:$0xff]  }
 0x72f   :  { %v4070_v51 = vpop.eup %4069 }
 0x730   :  { %v2434_v53 = vmul.f32 %v4070_v51, %v4056_v18  ;;  %v1983_v55 = vpop.permute.xlu1 %1982  ;;  %v4072_v58 = vpop.eup %4071  ;;  %v4004_v18 = vld [vmem:[#allocation10 + $0x20] sm:$0xff]  }
 0x731   :  { %v2774_v56 = vsel %vm1075_vm2, %v1983_v55, 0  ;;  %v2439_v0 = vmul.f32 %v4072_v58, %v4739_v26 }
 0x732   :  { %v2442_v60 = vpack.c.bf16 %v2434_v53, %v2434_v53 }
 0x733   :  { %v4074_v54 = vpop.eup %4073  ;;  %3815 = vmatmul.mubr.msk.bf16.vlgmr.msra.gmra.mrb[84].mxu1 %vm975_vm3, %v2445_v57  ;;  %v2447_v3 = vpack.c.bf16 %v2439_v0, %v2439_v0 }
 0x734   :  { %3825 = vmatpush3.bf16.msra.mxu1 %v2774_v56  ;;  %3797 = vmatmul.mubr.msk.bf16.vlgmr.msra.gmra.mrb[68].mxu0 %vm975_vm3, %v2442_v60  ;;  %v2436_v59 = vmul.f32 %v4074_v54, %v4744_v22  ;;  %v4012_v60 = vld [vmem:[#allocation10 + $0x68] sm:$0xff]  }
 0x735   :  { %3807 = vmatpush3.bf16.msra.mxu0 %v2636_v61  ;;  %3826 = vmatprep.mubr.msk.bf16.mxu1 %vm4228_vm0, %v4227_v52 }
 0x736   :  { %3808 = vmatprep.mubr.msk.bf16.mxu0 %vm4228_vm0, %v4227_v52  ;;  %3818 = vmatprep.subr.bf16.mxu0 %v4227_v52  ;;  %v2444_v4 = vpack.c.bf16 %v2436_v59, %v2436_v59 }
 0x737   :  { %3838 = vmatprep.subr.bf16.mxu1 %v4227_v52  ;;  %v4076_v62 = vpop.eup %4075 }
 0x738   :  { %v2438_v5 = vmul.f32 %v4076_v62, %v4748_v6  ;;  %v4006_v6 = vld [vmem:[#allocation10 + $0x28] sm:$0xff]  }
 0x73a   :  { %v2446_v8 = vpack.c.bf16 %v2438_v5, %v2438_v5 }
 0x73b   :  { %3827 = vmatmul.mubr.msk.bf16.vlgmr.msra.gmra.mrb[88].mxu1 %vm975_vm3, %v2447_v3 }
 0x73c   :  { %3809 = vmatmul.mubr.msk.bf16.vlgmr.msra.gmra.mrb[72].mxu0 %vm975_vm3, %v2444_v4  ;;  %3839 = vmatpush3.bf16.msra.mxu1 %v3997_v1 }
 0x73d   :  { %3819 = vmatpush3.bf16.msra.mxu0 %v2728_v7  ;;  %3820 = vmatprep.mubr.msk.bf16.mxu0 %vm4228_vm0, %v4227_v52 }
 0x73e   :  { %3840 = vmatprep.subr.bf16.mxu1 %v4227_v52  ;;  %3830 = vmatprep.subr.bf16.mxu0 %v4227_v52 }
 0x73f   :  { %3842 = vmatprep.mubr.msk.bf16.mxu1 %vm4228_vm0, %v4227_v52 }
 0x740   :  { %3841 = vmatpush3.bf16.msra.mxu1 %v3998_v11 }
 0x741   :  { %3854 = vmatprep.subr.bf16.mxu1 %v4227_v52 }
 0x744   :  { %3821 = vmatmul.mubr.msk.bf16.vlgmr.msra.gmra.mrb[76].mxu0 %vm975_vm3, %v2446_v8 }
 0x745   :  { %3834 = vmatprep.mubr.msk.bf16.mxu0 %vm4228_vm0, %v4227_v52  ;;  %3831 = vmatpush3.bf16.msra.mxu0 %v3999_v9 }
 0x746   :  { %3832 = vmatprep.subr.bf16.mxu0 %v4227_v52 }
 0x749   :  { %3833 = vmatpush3.bf16.msra.mxu0 %v4000_v30 }
 0x74a   :  { %3846 = vmatprep.subr.bf16.mxu0 %v4227_v52 }
 0x7c9   :  { %v2534_v10 = vpop.f32.mrb[76].mxu1 }
 0x7ca   :  { %v2817_v13 = vpack.c.bf16 %v2534_v10, %v2534_v10  ;;  %v3792_v14 = vpop.f32.mrb[77].mxu1 }
 0x7cb   :  { %v2537_v21 = vpop.f32.mrb[78].mxu1 }
 0x7cc   :  { %v3793_v16 = vpop.f32.mrb[79].mxu1  ;;  %3843 = vmatmul.mubr.msk.bf16.vlgmr.msra.gmra.mrb[92].mxu1 %vm606_vm1, %v2817_v13 }
 0x7cd   :  { %3855 = vmatpush3.bf16.msra.mxu1 %v4001_v12  ;;  %3858 = vmatprep.mubr.msk.bf16.mxu1 %vm4228_vm0, %v4227_v52 }
 0x7ce   :  { %v2488_v26 = vpop.f32.mrb[64].mxu0  ;;  %3856 = vmatprep.subr.bf16.mxu1 %v4227_v52 }
 0x7cf   :  { %v2816_v20 = vpack.c.bf16 %v2488_v26, %v2488_v26  ;;  %v3786_v23 = vpop.f32.mrb[65].mxu0 }
 0x7d0   :  { %v2491_v22 = vpop.f32.mrb[66].mxu0 }
 0x7d1   :  { %v3787_v15 = vpop.f32.mrb[67].mxu0  ;;  %3835 = vmatmul.mubr.msk.bf16.vlgmr.msra.gmra.mrb[80].mxu0 %vm606_vm1, %v2816_v20  ;;  %3857 = vmatpush3.bf16.msra.mxu1 %v4002_v17 }
 0x7d2   :  { %3870 = vmatprep.subr.bf16.mxu1 %v4227_v52  ;;  %3847 = vmatpush3.bf16.msra.mxu0 %v4004_v18 }
 0x7d3   :  { %3848 = vmatprep.subr.bf16.mxu0 %v4227_v52  ;;  %3850 = vmatprep.mubr.msk.bf16.mxu0 %vm4228_vm0, %v4227_v52 }
 0x7d6   :  { %3849 = vmatpush3.bf16.msra.mxu0 %v4006_v6 }
 0x7d7   :  { %3862 = vmatprep.subr.bf16.mxu0 %v4227_v52 }
 0x7fe   :  { %v2626_v50 = vpop.f32.mrb[80].mxu1 }
 0x7ff   :  { %v2819_v24 = vpack.c.bf16 %v2626_v50, %v2626_v50  ;;  %v3804_v28 = vpop.f32.mrb[81].mxu1 }
 0x800   :  { %v2629_v25 = vpop.f32.mrb[82].mxu1 }
 0x801   :  { %v3805_v27 = vpop.f32.mrb[83].mxu1  ;;  %3859 = vmatmul.mubr.msk.bf16.vlgmr.msra.gmra.mrb[96].mxu1 %vm606_vm1, %v2819_v24 }
 0x802   :  { %3871 = vmatpush3.bf16.msra.mxu1 %v4003_v19  ;;  %3874 = vmatprep.mubr.msk.bf16.mxu1 %vm4228_vm0, %v4227_v52 }
 0x803   :  { %3872 = vmatprep.subr.bf16.mxu1 %v4227_v52 }
 0x806   :  { %v2718_v31 = vpop.f32.mrb[84].mxu1  ;;  %3873 = vmatpush3.bf16.msra.mxu1 %v4005_v29 }
 0x807   :  { %v2821_v33 = vpack.c.bf16 %v2718_v31, %v2718_v31  ;;  %v2580_v34 = vpop.f32.mrb[68].mxu0  ;;  %v3816_v35 = vpop.f32.mrb[85].mxu1  ;;  %3886 = vmatprep.subr.bf16.mxu1 %v4227_v52 }
 0x808   :  { %v2818_v37 = vpack.c.bf16 %v2580_v34, %v2580_v34  ;;  %v3798_v38 = vpop.f32.mrb[69].mxu0  ;;  %v2721_v39 = vpop.f32.mrb[86].mxu1 }
 0x809   :  { %v2583_v40 = vpop.f32.mrb[70].mxu0  ;;  %v3817_v41 = vpop.f32.mrb[87].mxu1  ;;  %3875 = vmatmul.mubr.msk.bf16.vlgmr.msra.gmra.mrb[100].mxu1 %vm606_vm1, %v2821_v33 }
 0x80a   :  { %v3799_v42 = vpop.f32.mrb[71].mxu0  ;;  %3851 = vmatmul.mubr.msk.bf16.vlgmr.msra.gmra.mrb[84].mxu0 %vm606_vm1, %v2818_v37  ;;  %3887 = vmatpush3.bf16.msra.mxu1 %v4007_v32 }
 0x80b   :  { %3863 = vmatpush3.bf16.msra.mxu0 %v4008_v36  ;;  %3888 = vmatprep.subr.bf16.mxu1 %v4227_v52 }
 0x80c   :  { %3864 = vmatprep.subr.bf16.mxu0 %v4227_v52  ;;  %3890 = vmatprep.mubr.msk.bf16.mxu1 %vm4228_vm0, %v4227_v52 }
 0x80d   :  { %3866 = vmatprep.mubr.msk.bf16.mxu0 %vm4228_vm0, %v4227_v52 }
 0x80e   :  { %v2810_v45 = vpop.f32.mrb[88].mxu1  ;;  %3889 = vmatpush3.bf16.msra.mxu1 %v4009_v43 }
 0x80f   :  { %v2823_v46 = vpack.c.bf16 %v2810_v45, %v2810_v45  ;;  %v2672_v47 = vpop.f32.mrb[72].mxu0  ;;  %v3828_v48 = vpop.f32.mrb[89].mxu1  ;;  %3865 = vmatpush3.bf16.msra.mxu0 %v4010_v44 }
 0x810   :  { %v2820_v51 = vpack.c.bf16 %v2672_v47, %v2672_v47  ;;  %v3810_v53 = vpop.f32.mrb[73].mxu0  ;;  %v2813_v55 = vpop.f32.mrb[90].mxu1  ;;  %3878 = vmatprep.subr.bf16.mxu0 %v4227_v52 }
 0x811   :  { %v2675_v56 = vpop.f32.mrb[74].mxu0  ;;  %v3829_v57 = vpop.f32.mrb[91].mxu1  ;;  %3891 = vmatmul.mubr.msk.bf16.vlgmr.msra.gmra.mrb[104].mxu1 %vm606_vm1, %v2823_v46 }
 0x812   :  { %v3811_v58 = vpop.f32.mrb[75].mxu0  ;;  %3867 = vmatmul.mubr.msk.bf16.vlgmr.msra.gmra.mrb[88].mxu0 %vm606_vm1, %v2820_v51 }
 0x813   :  { %3879 = vmatpush3.bf16.msra.mxu0 %v4011_v49  ;;  %3882 = vmatprep.mubr.msk.bf16.mxu0 %vm4228_vm0, %v4227_v52 }
 0x814   :  { %3880 = vmatprep.subr.bf16.mxu0 %v4227_v52 }
 0x817   :  { %v2764_v54 = vpop.f32.mrb[76].mxu0  ;;  %3881 = vmatpush3.bf16.msra.mxu0 %v4012_v60 }
 0x818   :  { %v2822_v61 = vpack.c.bf16 %v2764_v54, %v2764_v54  ;;  %v3822_v0 = vpop.f32.mrb[77].mxu0 }
 0x819   :  { %v2767_v59 = vpop.f32.mrb[78].mxu0 }
 0x81a   :  { %v3823_v1 = vpop.f32.mrb[79].mxu0  ;;  %3883 = vmatmul.mubr.msk.bf16.vlgmr.msra.gmra.mrb[92].mxu0 %vm606_vm1, %v2822_v61 }
 0x89f   :  { %v2960_v2 = vpop.f32.mrb[92].mxu1 }
 0x8a0   :  { %v3844_v3 = vpop.f32.mrb[93].mxu1 }
 0x8a1   :  { %v2963_v4 = vpop.f32.mrb[94].mxu1 }
 0x8a2   :  { %v3845_v62 = vpop.f32.mrb[95].mxu1 }
 0x8a4   :  { %v2905_v7 = vpop.f32.mrb[80].mxu0 }
 0x8a5   :  { %v3296_v5 = vadd.f32 %v2960_v2, %v2905_v7  ;;  %v3836_v8 = vpop.f32.mrb[81].mxu0 }
 0x8a6   :  { %v2908_v11 = vpop.f32.mrb[82].mxu0 }
 0x8a7   :  { %v3837_v9 = vpop.f32.mrb[83].mxu0 }
 0x8d4   :  { %v3070_v30 = vpop.f32.mrb[96].mxu1 }
 0x8d5   :  { %v3860_v10 = vpop.f32.mrb[97].mxu1 }
 0x8d6   :  { %v3073_v52 = vpop.f32.mrb[98].mxu1 }
 0x8d7   :  { %v3861_v12 = vpop.f32.mrb[99].mxu1 }
 0x8dc   :  { %v3180_v13 = vpop.f32.mrb[100].mxu1 }
 0x8dd   :  { %v3015_v14 = vpop.f32.mrb[84].mxu0  ;;  %v3876_v21 = vpop.f32.mrb[101].mxu1 }
 0x8de   :  { %v3297_v16 = vadd.f32 %v3296_v5, %v3015_v14  ;;  %v3852_v17 = vpop.f32.mrb[85].mxu0  ;;  %v3183_v26 = vpop.f32.mrb[102].mxu1 }
 0x8df   :  { %v3018_v18 = vpop.f32.mrb[86].mxu0  ;;  %v3877_v20 = vpop.f32.mrb[103].mxu1 }
 0x8e0   :  { %v3853_v23 = vpop.f32.mrb[87].mxu0  ;;  %v3298_v22 = vadd.f32 %v3297_v16, %v3070_v30 }
 0x8e4   :  { %v3290_v15 = vpop.f32.mrb[104].mxu1 }
 0x8e5   :  { %v3125_v6 = vpop.f32.mrb[88].mxu0  ;;  %v3892_v50 = vpop.f32.mrb[105].mxu1 }
 0x8e6   :  { %v3299_v19 = vadd.f32 %v3298_v22, %v3125_v6  ;;  %v3868_v24 = vpop.f32.mrb[89].mxu0  ;;  %v3293_v28 = vpop.f32.mrb[106].mxu1 }
 0x8e7   :  { %v3128_v25 = vpop.f32.mrb[90].mxu0  ;;  %v3893_v27 = vpop.f32.mrb[107].mxu1 }
 0x8e8   :  { %v3869_v29 = vpop.f32.mrb[91].mxu0  ;;  %v3300_v31 = vadd.f32 %v3299_v19, %v3180_v13 }
 0x8ed   :  { %v3235_v32 = vpop.f32.mrb[92].mxu0 }
 0x8ee   :  { %v3301_v33 = vadd.f32 %v3300_v31, %v3235_v32  ;;  %v3884_v34 = vpop.f32.mrb[93].mxu0 }
 0x8ef   :  { %v3238_v35 = vpop.f32.mrb[94].mxu0 }
 0x8f0   :  { %v3302_v36 = vadd.f32 %v3301_v33, %v3290_v15  ;;  %v3885_v37 = vpop.f32.mrb[95].mxu0 }
 0x8f2   :  { %v3310_v38 = vadd.f32 %v4696_v63, %v3302_v36 }
 0x8f4   :  { %3312 = vst [vmem:[#allocation11 + $0x8] sm:$0xff] %v3310_v38 }
 0x8f5   :  { %4198 = shalt.err (!%p4195_p2)
}
 0x8f6   :  { %s4199_s18 = scalar_lea.hbm %s4857_s9, 256 }
 0x8f7   :  { %p4200_p3 = scmp.ne.s32.totalorder %s4857_s9, %s4199_s18  ;;  %p4203_p4 = scmp.lt.u32.totalorder %s4199_s18, %s4857_s9 }
 0x8f9   :  { %p4205_p5 = pnand %p4203_p4, %p4200_p3 }
 0x8fb   :  { %4208 = shalt.err (!%p4205_p5)
}
 0x8fc   :  { %3324 = dma.vmem_to_hbm [thread:$0]  %s3319_s14, 256, %s4857_s9, [#allocation4], %s4219_s21, %s4219_s21, %s4220_s22  }
 0x8fd   :  { %4215 = dma.done.wait [#allocation4], 256  }
 0x8fe   :  { %4216 = vsyncadd [#allocation4], 4294967040 }
 0x8ff   :  { %3328 = vsyncpa [#allocation3], 1 }
 0x900   :  { %3329 = vsyncpa [#allocation6], 1 }
 0x901   :  { %3330 = vsyncpa [#allocation9], 1 }
 0x902   :  { %3331 = vsyncpa [#allocation4], 1 }

</bundles_post_ra>
